<compile_context>
chip_gen: v7x
topology: tpu7x:2x2x1
jax: 0.10.0
libtpu: 0.0.40
codegen_flags: <defaults>
</compile_context>

<pallas_src>
import numpy as np
import jax
import jax.numpy as jnp
from jax.experimental import pallas as pl
from jax.experimental.pallas import tpu as pltpu

BLK = 8          # qmat.shape[1] == qmat.shape[2] == 8 (JPEG-style blocks)
NQ = 6           # qmat.shape[0]  (number of quantization matrices in qmats.mat)
PI = 3.1415926   # literal used by the PyTorch module (not math.pi)


# ------------------------------------------------------------------ DCT basis
def make_dct_matrix(n=BLK):
    C = np.zeros((n, n), dtype=np.float32)
    C[0, :] = np.sqrt(1.0 / n)
    for i in range(1, n):
        for j in range(n):
            C[i, j] = np.cos(PI * i * (2 * j + 1) / (2.0 * n)) * np.sqrt(2.0 / n)
    return jnp.asarray(C, dtype=jnp.float32)


# ------------------------------------------------------------------ Pallas kernel
def dct_branch_kernel(x_ref, a_ref, low_ref, high_ref):
    # x_ref:  (tn, S)    strips of 8 image rows, S = 8*W = 512 lanes (lane-dense)
    # a_ref:  (S, 2S)    fused [DCT·diag(q)·IDCT | DCT·diag(1-q)·IDCT] operator
    # low/high: (tn, S)  written directly in NCHW strip layout (512-lane stores)
    o = jnp.dot(x_ref[...], a_ref[...], preferred_element_type=jnp.float32)
    s = low_ref.shape[-1]
    low_ref[...] = o[:, :s]
    high_ref[...] = o[:, s:]


def _pick_rows_per_step(n_rows, cap=256):
    # Largest multiple-of-8 divisor of n_rows that is <= cap (VMEM budget),
    # keeping >= 2 grid steps when possible so the "parallel" axis can be
    # sharded across v7x's 2 TensorCores.
    if n_rows <= 8:
        return n_rows
    target = min(cap, n_rows // 2 if n_rows >= 16 else n_rows)
    target = max(8, (target // 8) * 8)
    for t in range(target, 7, -8):
        if n_rows % t == 0:
            return t
    return n_rows


def dct_strips_pallas(xs, A):
    N, S = xs.shape
    S2 = A.shape[1]
    tn = _pick_rows_per_step(N)
    assert N % tn == 0
    return pl.pallas_call(
        dct_branch_kernel,
        out_shape=(jax.ShapeDtypeStruct((N, S), jnp.float32),
                   jax.ShapeDtypeStruct((N, S), jnp.float32)),
        grid_spec=pltpu.PrefetchScalarGridSpec(
            num_scalar_prefetch=0,
            grid=(N // tn,),
            in_specs=[pl.BlockSpec((tn, S), lambda i: (i, 0)),
                      pl.BlockSpec((S, S2), lambda i: (0, 0))],
            out_specs=[pl.BlockSpec((tn, S), lambda i: (i, 0)),
                       pl.BlockSpec((tn, S), lambda i: (i, 0))]),
        compiler_params=pltpu.CompilerParams(
            dimension_semantics=("parallel",)),
    )(xs, A)


# ------------------------------------------------------------------ parameters
def init_params(key):
    ks = jax.random.split(key, 8)
    params = {
        # TODO(synk): qmats.mat ('qmat_64') is loaded from disk in the original;
        # replaced with a synthetic random parameter of the same (NQ, 8, 8) shape.
        "qmat": jax.random.uniform(ks[0], (NQ, BLK, BLK), jnp.float32),
        "qmat64_weights": jnp.ones((NQ,), jnp.float32),
        # noise_level_net: Linear(1,16) -> GELU -> Linear(16,16) -> GELU -> Linear(16, 2+NQ)
        "w1": jax.random.normal(ks[1], (1, 16), jnp.float32) * 0.2,
        "b1": jnp.zeros((16,), jnp.float32),
        "w2": jax.random.normal(ks[2], (16, 16), jnp.float32) * 0.2,
        "b2": jnp.zeros((16,), jnp.float32),
        "w3": jax.random.normal(ks[3], (16, 2 + NQ), jnp.float32) * 0.2,
        "b3": jnp.zeros((2 + NQ,), jnp.float32),
    }
    return params


# ------------------------------------------------------------------ forward
def net_forward(params, x, noise_level):
    B, C, H, W = x.shape
    assert H % BLK == 0 and W % BLK == 0

    # --- noise_level_net + learned qmat (tiny MLP, plain JAX glue)
    h = jax.nn.gelu(noise_level @ params["w1"] + params["b1"], approximate=False)
    h = jax.nn.gelu(h @ params["w2"] + params["b2"], approximate=False)
    refine = h @ params["w3"] + params["b3"]                                 # (2+NQ,)
    qw = jax.nn.softmax(params["qmat64_weights"]) * refine[0] + refine[1]
    learned_qmat = jnp.einsum("k,khw->hw", qw * refine[2:], params["qmat"])  # (8, 8)
    qvec = learned_qmat.reshape(BLK * BLK)

    # --- fused per-block operator: K = M^T diag(q) M   (M = kron(C, C))
    Cm = make_dct_matrix(BLK)
    M = jnp.kron(Cm, Cm)                                   # (64, 64)
    Mt = M.T
    hp = jax.lax.Precision.HIGHEST
    K_low = jnp.dot(Mt, qvec[:, None] * M, precision=hp)           # (64, 64)
    K_high = jnp.dot(Mt, (1.0 - qvec)[:, None] * M, precision=hp)  # (64, 64)

    # --- expand to the strip layout: columns of a strip are (i, c, j) with
    #     i = row-in-block, c = column-block, j = col-in-block; the operator is
    #     block-diagonal (identity) over c.
    nc = W // BLK
    S = BLK * W
    eye = jnp.eye(nc, dtype=jnp.float32)

    def expand(K):
        K4 = K.reshape(BLK, BLK, BLK, BLK)                            # [i, j, i', j']
        A6 = K4[:, None, :, :, None, :] * eye[None, :, None, None, :, None]
        return A6.reshape(S, S)                                       # [(i,c,j),(i',c',j')]

    A = jnp.concatenate([expand(K_low), expand(K_high)], axis=1)      # (S, 2S)

    # --- view NCHW as 8-row strips: contiguous reshape, no unfold/transpose
    n_rows = (B * C * H) // BLK
    xs = x.reshape(n_rows, S).astype(jnp.float32)

    # --- hot path: single fused matmul per tile
    low_s, high_s = dct_strips_pallas(xs, A)

    # --- contiguous reshape back to NCHW (free; replaces nn.Fold)
    return low_s.reshape(B, C, H, W), high_s.reshape(B, C, H, W)


# ------------------------------------------------------------------ pure-JAX reference
def reference_forward(params, x, noise_level):
    B, C, H, W = x.shape
    Hb, Wb = H // BLK, W // BLK
    blocks = x.reshape(B, C, Hb, BLK, Wb, BLK).transpose(0, 1, 2, 4, 3, 5)
    blocks = blocks.reshape(-1, BLK, BLK).astype(jnp.float32)

    h = jax.nn.gelu(noise_level @ params["w1"] + params["b1"], approximate=False)
    h = jax.nn.gelu(h @ params["w2"] + params["b2"], approximate=False)
    refine = h @ params["w3"] + params["b3"]
    qw = jax.nn.softmax(params["qmat64_weights"]) * refine[0] + refine[1]
    q = jnp.einsum("k,khw->hw", qw * refine[2:], params["qmat"])

    Cm = make_dct_matrix(BLK)
    dct = jnp.einsum("ij,bjk,lk->bil", Cm, blocks, Cm)
    low = jnp.einsum("ji,bjk,kl->bil", Cm, dct * q, Cm)
    high = jnp.einsum("ji,bjk,kl->bil", Cm, dct * (1.0 - q), Cm)

    def fold(b):
        y = b.reshape(B, C, Hb, Wb, BLK, BLK).transpose(0, 1, 2, 4, 3, 5)
        return y.reshape(B, C, H, W)

    return fold(low), fold(high)


# ------------------------------------------------------------------ main
if __name__ == "__main__":
    key = jax.random.PRNGKey(0)
    kp, kx, kn = jax.random.split(key, 3)
    params = init_params(kp)

    # nn.Fold in the module hard-codes output_size=(64, 64), so H = W = 64.
    B, C, H, W = 2, 4, 64, 64
    x = jax.random.normal(kx, (B, C, H, W), jnp.float32)
    noise_level = jnp.array([0.1], dtype=jnp.float32)   # shape (1,) -> Linear(1, 16)

    low, high = net_forward(params, x, noise_level)
    low = jax.block_until_ready(low)
    high = jax.block_until_ready(high)

    low_ref, high_ref = reference_forward(params, x, noise_level)
    np.testing.assert_allclose(np.asarray(low), np.asarray(low_ref),
                               rtol=1e-4, atol=1e-3)
    np.testing.assert_allclose(np.asarray(high), np.asarray(high_ref),
                               rtol=1e-4, atol=1e-3)

    print("KERNEL_OK")
</pallas_src>

<mosaic_0001>
module attributes {stable_mosaic.version = 11 : i64} {
  func.func @dct_branch_kernel(%arg0: i32, %arg1: memref<32x512xf32, #tpu.memory_space<vmem>>, %arg2: memref<512x1024xf32, #tpu.memory_space<vmem>>, %arg3: memref<32x512xf32, #tpu.memory_space<vmem>>, %arg4: memref<32x512xf32, #tpu.memory_space<vmem>>) attributes {dimension_semantics = [#tpu.dimension_semantics<parallel>], iteration_bounds = array<i64: 2>, scalar_prefetch = 0 : i64, scratch_operands = 0 : i64, tpu.core_type = #tpu.core_type<tc>, window_params = [{transform_indices = @transform_0, window_bounds = array<i64: 32, 512>}, {pipeline_mode = #tpu.pipeline_mode<synchronous>, transform_indices = @transform_1, window_bounds = array<i64: 512, 1024>}, {transform_indices = @transform_2, window_bounds = array<i64: 32, 512>}, {transform_indices = @transform_3, window_bounds = array<i64: 32, 512>}]} {
    %c0 = arith.constant 0 : index
    %c0_0 = arith.constant 0 : index
    %0 = vector.load %arg1[%c0, %c0_0] : memref<32x512xf32, #tpu.memory_space<vmem>>, vector<32x512xf32>
    %c0_1 = arith.constant 0 : index
    %c0_2 = arith.constant 0 : index
    %1 = vector.load %arg2[%c0_1, %c0_2] : memref<512x1024xf32, #tpu.memory_space<vmem>>, vector<512x1024xf32>
    %cst = arith.constant dense<0.000000e+00> : vector<32x1024xf32>
    %2 = tpu.matmul %0, %1, %cst {dimension_numbers = #tpu.dot_dimension_numbers<[1], [0], [0], [1], [0, 0, 1, 1], [], []>} : vector<32x512xf32>, vector<512x1024xf32>, vector<32x1024xf32> -> vector<32x1024xf32>
    %3 = vector.extract_strided_slice %2 {offsets = [0, 0], sizes = [32, 512], strides = [1, 1]} : vector<32x1024xf32> to vector<32x512xf32>
    %c0_3 = arith.constant 0 : index
    %c0_4 = arith.constant 0 : index
    %4 = vector.load %arg3[%c0_3, %c0_4] : memref<32x512xf32, #tpu.memory_space<vmem>>, vector<32x512xf32>
    tpu.vector_store %arg3[%c0_3, %c0_4], %3 {strides = array<i32>} : memref<32x512xf32, #tpu.memory_space<vmem>>, vector<32x512xf32>,
    %5 = vector.extract_strided_slice %2 {offsets = [0, 512], sizes = [32, 512], strides = [1, 1]} : vector<32x1024xf32> to vector<32x512xf32>
    %c0_5 = arith.constant 0 : index
    %c0_6 = arith.constant 0 : index
    %6 = vector.load %arg4[%c0_5, %c0_6] : memref<32x512xf32, #tpu.memory_space<vmem>>, vector<32x512xf32>
    tpu.vector_store %arg4[%c0_5, %c0_6], %5 {strides = array<i32>} : memref<32x512xf32, #tpu.memory_space<vmem>>, vector<32x512xf32>,
    return
  }
  func.func @transform_0(%arg0: i32) -> (i32, i32) {
    %c0_i32 = arith.constant 0 : i32
    %c0_i32_0 = arith.constant 0 : i32
    return %arg0, %c0_i32 : i32, i32
  }
  func.func @transform_1(%arg0: i32) -> (i32, i32) {
    %c0_i32 = arith.constant 0 : i32
    %c0_i32_0 = arith.constant 0 : i32
    %c0_i32_1 = arith.constant 0 : i32
    return %c0_i32, %c0_i32_0 : i32, i32
  }
  func.func @transform_2(%arg0: i32) -> (i32, i32) {
    %c0_i32 = arith.constant 0 : i32
    %c0_i32_0 = arith.constant 0 : i32
    return %arg0, %c0_i32 : i32, i32
  }
  func.func @transform_3(%arg0: i32) -> (i32, i32) {
    %c0_i32 = arith.constant 0 : i32
    %c0_i32_0 = arith.constant 0 : i32
    return %arg0, %c0_i32 : i32, i32
  }
}

</mosaic_0001>

<bundles_post_ra>
// kernel: tpu_custom_call.1
= control target key start
LH: loop header
LB: loop body
LE: loop exit
PB: predicated region body
PF: predicated region fallthrough
CT: control target
= control target key end

     0   :  { %9 = vsyncpa [#allocation3], 0  ;;  %s2828_s0 = inlined_call_operand.hbm [shape: f32[64,512], index: 0, kind: input, shape index: {}]   ;;  %s2829_s1 = inlined_call_operand.hbm [shape: f32[512,1024], index: 1, kind: input, shape index: {}]   ;;  %s2830_s2 = inlined_call_operand.hbm [shape: f32[64,512], index: 2, kind: output, shape index: {0}]   ;;  %s2831_s3 = inlined_call_operand.hbm [shape: f32[64,512], index: 3, kind: output, shape index: {1}]  }
   0x1   :  { %11 = vsyncpa [#allocation3 + $0x1], 0 }
   0x2   :  { %12 = vsyncpa [#allocation6], 0 }
   0x3   :  { %13 = vsyncpa [#allocation4], 0 }
   0x4   :  { %15 = vsyncpa [#allocation4 + $0x1], 0 }
   0x5   :  { %16 = vsyncpa [#allocation9], 0 }
   0x6   :  { %18 = vsyncpa [#allocation9 + $0x1], 0  ;;  %s2489_s12 = smov 0   ;;  %s2491_s13 = smov 0  }
   0x7   :  { %s2493_s14 = smov 0   ;;  %s2495_s15 = smov 0  }
   0x8 LB: > { %s2510_s16 = sadd.s32 4294967295, %s2457_s15   ;;  %s1643_s17 = sadd.s32 4294967294, %s2457_s15   ;;  %s2457_s15 = sphi %s2495_s15, %s2851_s15   ;;  %s2453_s14 = sphi %s2493_s14, %s2850_s14   ;;  %s2449_s13 = sphi %s2491_s13, %s2849_s13   ;;  %s2445_s12 = sphi %s2489_s12, %s2848_s12  }
   0x9   : > { %p44_p0 = scmp.ne.s32.totalorder %s2449_s13, %s2445_s12  ;;  %p2832_p1 = scmp.eq.s32.totalorder %s2510_s16, 0 }
   0xa   : > { %p95_p3 = scmp.eq.s32.totalorder %s1643_s17, 1  ;;  %p1644_p5 = scmp.ge.s32.totalorder %s2457_s15, 1 }
   0xb   : > { %p2519_p4 = por %p2832_p1, %p44_p0  ;;  %p128_p7 = scmp.lt.s32.totalorder %s2457_s15, 3 }
   0xc   : > { %p2524_p6 = por %p95_p3, %p44_p0  ;;  %s2459_s21 = smov [#allocation5]  }
   0xd   : > { %s2835_s18 = scalar_select %p2519_p4, 1, 0 }
   0xe   : > { %s2836_s19 = scalar_select %p2524_p6, 1, 0 }
   0xf   : > { %p2529_p8 = pnand %p1644_p5, %p128_p7  ;;  %s140_s22 = sshll.u32 %s2459_s21, 4  ;;  %s2533_s22 = int_to_ptr.vmem [resolvable:$true] %s140_s22 }
  0x10   : > { %s2545_s24 = sadd.s32 1, %s2457_s15   ;;  %s31_s25 = sadd.s32 1, %s2453_s14 }
  0x11   : > { %s2837_s20 = scalar_select %p2529_p8, 1, 0 }
  0x12   : > { %p2226_p9 = pneg %p2529_p8  ;;  %s28_s26 = ssub.s32 %s2457_s15, %s2545_s24 }
  0x13   : > { %s2297_s29 = scalar_lea.hbm %s2829_s1, 65536 }
  0x14   : > { %p2540_p11 = pnand %p2226_p9, %p2832_p1  ;;  %p2298_p12 = scmp.ne.s32.totalorder %s2829_s1, %s2297_s29 }
  0x15   : > { %p2304_p5 = scmp.lt.u32.totalorder %s2297_s29, %s2829_s1 }
  0x16   : > { %p2299_p13 = pneg %p2540_p11 }
  0x18   : > { %p2300_p0 = pnand %p2299_p13, %p2298_p12 }
  0x1a   : > { %p2301_p3 = pneg %p2300_p0 }
  0x1c   : > { %p2306_p7 = pnand %p2304_p5, %p2301_p3 }
  0x1e   : > { %2309 = shalt.err (!%p2306_p7)
}
  0x1f   : > { %s2310_s7 = scalar_lea.vmem %s2533_s22, 65536  ;;  %p2318_p2 = scmp.lt.s32.totalorder %s2533_s22, %s2533_s22 }
  0x20   : > { %p2311_p9 = scmp.ne.s32.totalorder %s2533_s22, %s2310_s7  ;;  %p2319_p6 = scmp.lt.s32.totalorder %s2310_s7, %s2310_s7 }
  0x22   : > { %p2313_p10 = pnand %p2311_p9, %p2299_p13  ;;  %p2320_p4 = por %p2319_p6, %p2318_p2 }
  0x24   : > { %p2314_p1 = pneg %p2313_p10 }
  0x26   : > { %p2321_p8 = pnand %p2320_p4, %p2314_p1 }
  0x28   : > { %2324 = shalt.err (!%p2321_p8)
}
  0x29   : > { %s2460_s8 = smov 1024   ;;  %s2461_s9 = smov 64  }
  0x2a   : > { %2229 = dma.hbm_to_vmem [thread:$0]  (!%p2540_p11), %s2829_s1, 65536, %s2533_s22, [#allocation6], %s2460_s8, %s2460_s8, %s2461_s9  }
  0x2b   : > { %p29_p2 = scmp.eq.s32.totalorder %s28_s26, 0  ;;  %p38_p1 = scmp.ne.s32.totalorder %s2453_s14, %s2449_s13 }
  0x2c   : > { %p39_p4 = scmp.eq.s32.totalorder %s2457_s15, 0  ;;  %p2242_p6 = scmp.lt.s32.totalorder %s2457_s15, 2 }
  0x2d   : > { %s2576_s17 = scalar_select %p29_p2, %s2453_s14, %s31_s25  }
  0x2e   : > { %p40_p8 = por %p39_p4, %p38_p1  ;;  %p2839_p10 = scmp.eq.s32.totalorder %s2510_s16, 1 }
  0x2f   : > { %s154_s27 = sand.u32 1, %s2453_s14   ;;  %s1667_s28 = sshll.u32 %s2457_s15, 11 }
  0x30   : > { %p2580_p12 = por %p2839_p10, %p38_p1  ;;  %s1647_s29 = sshll.u32 %s154_s27, 7 }
  0x31   : > { %s2589_s4 = scalar_lea.hbm %s2828_s0, %s1667_s28  ;;  %s158_s22 = scalar_lea.vmem [#allocation2], %s1647_s29 }
  0x32   : > { %s166_s25 = sshll.u32 %s158_s22, 4  ;;  %p2591_p11 = pnand %p2242_p6, %p40_p8  ;;  %s2595_s25 = int_to_ptr.vmem [resolvable:$true] %s166_s25 }
  0x33   : > { %s2597_s5 = scalar_lea.sflag [#allocation3], %s154_s27  ;;  %s2325_s6 = scalar_lea.hbm %s2589_s4, 2048 }
  0x34   : > { %p2326_p13 = scmp.ne.s32.totalorder %s2589_s4, %s2325_s6  ;;  %p2327_p0 = pneg %p2591_p11 }
  0x35   : > { %s2330_s9 = scalar_lea.hbm %s2828_s0, 4096  ;;  %p2331_p7 = scmp.lt.u32.totalorder %s2589_s4, %s2828_s0 }
  0x36   : > { %p2328_p3 = pnand %p2327_p0, %p2326_p13  ;;  %p2332_p9 = scmp.lt.u32.totalorder %s2330_s9, %s2325_s6 }
  0x37   : > { %p2334_p1 = scmp.lt.u32.totalorder %s2325_s6, %s2589_s4 }
  0x38   : > { %p2329_p5 = pneg %p2328_p3  ;;  %p2333_p2 = por %p2332_p9, %p2331_p7 }
  0x3a   : > { %p2335_p4 = por %p2334_p1, %p2333_p2 }
  0x3c   : > { %p2336_p6 = pnand %p2335_p4, %p2329_p5 }
  0x3e   : > { %2339 = shalt.err (!%p2336_p6)
}
  0x3f   : > { %s2340_s27 = scalar_lea.vmem %s2595_s25, 2048  ;;  %s2462_s28 = smov [#allocation2]  }
  0x40   : > { %p2341_p8 = scmp.ne.s32.totalorder %s2595_s25, %s2340_s27  ;;  %s2345_s29 = sshll.u32 %s2462_s28, 4  ;;  %s2346_s29 = int_to_ptr.vmem [resolvable:$false] %s2345_s29 }
  0x41   : > { %s2347_s23 = scalar_lea.vmem %s2346_s29, 4096  ;;  %p2348_p3 = scmp.lt.s32.totalorder %s2595_s25, %s2346_s29 }
  0x42   : > { %p2343_p10 = pnand %p2341_p8, %p2327_p0  ;;  %p2349_p7 = scmp.lt.s32.totalorder %s2347_s23, %s2340_s27 }
  0x44   : > { %p2344_p13 = pneg %p2343_p10  ;;  %p2350_p9 = por %p2349_p7, %p2348_p3 }
  0x46   : > { %p2351_p2 = pnand %p2350_p9, %p2344_p13 }
  0x48   : > { %2354 = shalt.err (!%p2351_p2)
}
  0x49   : > { %s2463_s30 = smov 512   ;;  %s2464_s22 = smov 32  }
  0x4a   : > { %2233 = dma.hbm_to_vmem [thread:$0]  (!%p2591_p11), %s2589_s4, 2048, %s2595_s25, %s2597_s5, %s2463_s30, %s2463_s30, %s2464_s22  }
  0x4b   : > { %p2842_p0 = scmp.ne.s32.totalorder %s2837_s20, 0 }
  0x4c   : > { %s2628_s6 = sand.u32 (!%p2842_p0), 1, %s2449_s13   ;;  %p2843_p5 = scmp.ne.s32.totalorder (!%p2842_p0), %s2835_s18, 0 }
  0x4d   : > { %178 = sbr.rel (%p2842_p0) target bundleno = 588 (0x24c), region = 28  ;;  %s2631_s7 = sshll.u32 (!%p2842_p0), %s2628_s6, 7 }
  0x4e   : > { %s181_s8 = scalar_lea.sflag (!%p2842_p0), [#allocation3], %s2628_s6  ;;  %s2635_s9 = scalar_lea.vmem (!%p2842_p0), [#allocation2], %s2631_s7 }
  0x54   : > { %2428 = dma.done.wait (%p2843_p5), %s181_s8, 2048  }
  0x55   : > { %2430 = vsyncadd (%p2843_p5), %s181_s8, 4294965248  ;;  %p2844_p11 = scmp.eq.s32.totalorder %s2510_s16, 0 }
  0x57   : > { %2432 = dma.done.wait (%p2844_p11), [#allocation6], 65536   ;;  %p2845_p1 = pmov %p2844_p11 }
  0x58   : > { %v236_v0 = vld [vmem:[#allocation5 + $0x8] sm:$0xff]  ;;  %v238_v2 = vld [vmem:[#allocation5 + $0x18] sm:$0xff]  ;;  %v235_v5 = vld [vmem:[#allocation5] sm:$0xff]  ;;  %s2698_s18 = scalar_lea.vmem [#allocation7], %s2631_s7  ;;  %s1669_s20 = sshll.u32 %s2510_s16, 11 }
  0x59   : > { %2434 = vsyncadd (%p2845_p1), [#allocation6], 4294901760  ;;  %v244_v1 = vld [vmem:[#allocation5 + $0x48] sm:$0xff]  ;;  %v246_v4 = vld [vmem:[#allocation5 + $0x58] sm:$0xff]  ;;  %s1511_s4 = sshll.u32 %s2698_s18, 4  ;;  %s2723_s5 = scalar_lea.hbm %s2830_s2, %s1669_s20  ;;  %s2725_s4 = int_to_ptr.vmem [resolvable:$true] %s1511_s4 }
  0x5a   : > { %v1672_v3 = vpack.c.bf16 %v244_v1, %v236_v0  ;;  %v243_v6 = vld [vmem:[#allocation5 + $0x40] sm:$0xff]  ;;  %v1800_v7 = vpack.c.bf16 %v246_v4, %v238_v2  ;;  %v237_v9 = vld [vmem:[#allocation5 + $0x10] sm:$0xff]  ;;  %v252_v11 = vld [vmem:[#allocation5 + $0x88] sm:$0xff]  ;;  %s1492_s10 = scalar_lea.sflag [#allocation4], %s2628_s6  ;;  %s2355_s11 = scalar_lea.vmem %s2725_s4, 2048 }
  0x5b   : > { %v1674_v8 = vpack.c.bf16 %v243_v6, %v235_v5  ;;  %v245_v10 = vld [vmem:[#allocation5 + $0x50] sm:$0xff]  ;;  %v260_v13 = vld [vmem:[#allocation5 + $0xc8] sm:$0xff]  ;;  %v254_v14 = vld [vmem:[#allocation5 + $0x98] sm:$0xff]  ;;  %p2356_p4 = scmp.ne.s32.totalorder %s2725_s4, %s2355_s11  ;;  %s2465_s27 = smov [#allocation7]  }
  0x5c   : > { %1673 = vmatprep.subr.bf16.mxu0 %v1672_v3  ;;  %v1802_v12 = vpack.c.bf16 %v245_v10, %v237_v9  ;;  %v262_v15 = vld [vmem:[#allocation5 + $0xd8] sm:$0xff]  ;;  %1801 = vmatprep.subr.bf16.mxu1 %v1800_v7  ;;  %v1676_v16 = vpack.c.bf16 %v260_v13, %v252_v11  ;;  %v251_v18 = vld [vmem:[#allocation5 + $0x80] sm:$0xff]  ;;  %v253_v20 = vld [vmem:[#allocation5 + $0x90] sm:$0xff]  ;;  %s2359_s28 = sshll.u32 %s2465_s27, 4  ;;  %s2360_s28 = int_to_ptr.vmem [resolvable:$false] %s2359_s28 }
  0x5d   : > { %1675 = vmatpush1.bf16.msra.mxu0 %v1674_v8  ;;  %v1804_v17 = vpack.c.bf16 %v262_v15, %v254_v14  ;;  %v259_v19 = vld [vmem:[#allocation5 + $0xc0] sm:$0xff]  ;;  %v261_v22 = vld [vmem:[#allocation5 + $0xd0] sm:$0xff]  ;;  %v268_v23 = vld [vmem:[#allocation5 + $0x108] sm:$0xff]  ;;  %p2357_p6 = pnand %p2356_p4, %p2580_p12  ;;  %s2361_s29 = scalar_lea.vmem %s2360_s28, 4096 }
  0x5e   : > { %1803 = vmatpush1.bf16.msra.mxu1 %v1802_v12  ;;  %v1678_v21 = vpack.c.bf16 %v259_v19, %v251_v18  ;;  %v276_v24 = vld [vmem:[#allocation5 + $0x148] sm:$0xff]  ;;  %1677 = vmatprep.subr.bf16.mxu0 %v1676_v16  ;;  %v1806_v25 = vpack.c.bf16 %v261_v22, %v253_v20  ;;  %v270_v27 = vld [vmem:[#allocation5 + $0x118] sm:$0xff]  ;;  %v267_v29 = vld [vmem:[#allocation5 + $0x100] sm:$0xff]  ;;  %p2362_p10 = scmp.lt.s32.totalorder %s2725_s4, %s2360_s28  ;;  %p2363_p13 = scmp.lt.s32.totalorder %s2361_s29, %s2355_s11 }
  0x5f   : > { %1805 = vmatprep.subr.bf16.mxu1 %v1804_v17  ;;  %v1680_v26 = vpack.c.bf16 %v276_v24, %v268_v23  ;;  %v278_v28 = vld [vmem:[#allocation5 + $0x158] sm:$0xff]  ;;  %v275_v31 = vld [vmem:[#allocation5 + $0x140] sm:$0xff]  ;;  %v269_v32 = vld [vmem:[#allocation5 + $0x110] sm:$0xff]  ;;  %p2358_p8 = pneg %p2357_p6 }
  0x60   : > { %v1808_v30 = vpack.c.bf16 %v278_v28, %v270_v27  ;;  %v277_v33 = vld [vmem:[#allocation5 + $0x150] sm:$0xff]  ;;  %v1682_v34 = vpack.c.bf16 %v275_v31, %v267_v29  ;;  %v284_v35 = vld [vmem:[#allocation5 + $0x188] sm:$0xff]  ;;  %v286_v37 = vld [vmem:[#allocation5 + $0x198] sm:$0xff]  ;;  %p2364_p3 = por %p2363_p13, %p2362_p10 }
  0x61   : > { %1679 = vmatpush1.bf16.msra.mxu0 %v1678_v21  ;;  %v292_v36 = vld [vmem:[#allocation5 + $0x1c8] sm:$0xff]  ;;  %v1810_v38 = vpack.c.bf16 %v277_v33, %v269_v32  ;;  %v294_v40 = vld [vmem:[#allocation5 + $0x1d8] sm:$0xff]  ;;  %v283_v41 = vld [vmem:[#allocation5 + $0x180] sm:$0xff] }
  0x62   : > { %1807 = vmatpush1.bf16.msra.mxu1 %v1806_v25  ;;  %1681 = vmatprep.subr.bf16.mxu0 %v1680_v26  ;;  %v1684_v39 = vpack.c.bf16 %v292_v36, %v284_v35  ;;  %v291_v42 = vld [vmem:[#allocation5 + $0x1c0] sm:$0xff]  ;;  %v1812_v43 = vpack.c.bf16 %v294_v40, %v286_v37  ;;  %v285_v44 = vld [vmem:[#allocation5 + $0x190] sm:$0xff]  ;;  %v300_v46 = vld [vmem:[#allocation5 + $0x208] sm:$0xff]  ;;  %p2365_p7 = pnand %p2364_p3, %p2358_p8 }
  0x63   : > { %1809 = vmatprep.subr.bf16.mxu1 %v1808_v30  ;;  %v293_v45 = vld [vmem:[#allocation5 + $0x1d0] sm:$0xff]  ;;  %v308_v47 = vld [vmem:[#allocation5 + $0x248] sm:$0xff]  ;;  %v302_v48 = vld [vmem:[#allocation5 + $0x218] sm:$0xff]  ;;  %v1686_v50 = vpack.c.bf16 %v291_v42, %v283_v41 }
  0x64   : > { %v310_v49 = vld [vmem:[#allocation5 + $0x258] sm:$0xff]  ;;  %v1814_v51 = vpack.c.bf16 %v293_v45, %v285_v44  ;;  %v1688_v52 = vpack.c.bf16 %v308_v47, %v300_v46  ;;  %v299_v53 = vld [vmem:[#allocation5 + $0x200] sm:$0xff]  ;;  %v301_v55 = vld [vmem:[#allocation5 + $0x210] sm:$0xff] }
  0x65   : > { %1683 = vmatpush1.bf16.msra.mxu0 %v1682_v34  ;;  %v307_v54 = vld [vmem:[#allocation5 + $0x240] sm:$0xff]  ;;  %v1816_v56 = vpack.c.bf16 %v310_v49, %v302_v48  ;;  %v309_v57 = vld [vmem:[#allocation5 + $0x250] sm:$0xff]  ;;  %v316_v58 = vld [vmem:[#allocation5 + $0x288] sm:$0xff] }
  0x66   : > { %1811 = vmatpush1.bf16.msra.mxu1 %v1810_v38  ;;  %1685 = vmatprep.subr.bf16.mxu0 %v1684_v39  ;;  %v324_v59 = vld [vmem:[#allocation5 + $0x2c8] sm:$0xff]  ;;  %v318_v60 = vld [vmem:[#allocation5 + $0x298] sm:$0xff]  ;;  %v1690_v62 = vpack.c.bf16 %v307_v54, %v299_v53  ;;  %v1818_v63 = vpack.c.bf16 %v309_v57, %v301_v55  ;;  %v315_v1 = vld [vmem:[#allocation5 + $0x280] sm:$0xff] }
  0x67   : > { %1813 = vmatprep.subr.bf16.mxu1 %v1812_v43  ;;  %v326_v61 = vld [vmem:[#allocation5 + $0x2d8] sm:$0xff]  ;;  %v1692_v0 = vpack.c.bf16 %v324_v59, %v316_v58  ;;  %v323_v2 = vld [vmem:[#allocation5 + $0x2c0] sm:$0xff]  ;;  %v317_v3 = vld [vmem:[#allocation5 + $0x290] sm:$0xff] }
  0x68   : > { %v1820_v4 = vpack.c.bf16 %v326_v61, %v318_v60  ;;  %v325_v5 = vld [vmem:[#allocation5 + $0x2d0] sm:$0xff]  ;;  %v332_v6 = vld [vmem:[#allocation5 + $0x308] sm:$0xff]  ;;  %v334_v8 = vld [vmem:[#allocation5 + $0x318] sm:$0xff]  ;;  %v1694_v10 = vpack.c.bf16 %v323_v2, %v315_v1 }
  0x69   : > { %1687 = vmatpush1.bf16.msra.mxu0 %v1686_v50  ;;  %v340_v7 = vld [vmem:[#allocation5 + $0x348] sm:$0xff]  ;;  %v342_v9 = vld [vmem:[#allocation5 + $0x358] sm:$0xff]  ;;  %v1822_v11 = vpack.c.bf16 %v325_v5, %v317_v3  ;;  %v331_v13 = vld [vmem:[#allocation5 + $0x300] sm:$0xff] }
  0x6a   : > { %1815 = vmatpush1.bf16.msra.mxu1 %v1814_v51  ;;  %1689 = vmatprep.subr.bf16.mxu0 %v1688_v52  ;;  %v1696_v12 = vpack.c.bf16 %v340_v7, %v332_v6  ;;  %v339_v14 = vld [vmem:[#allocation5 + $0x340] sm:$0xff]  ;;  %v333_v15 = vld [vmem:[#allocation5 + $0x310] sm:$0xff]  ;;  %v1824_v16 = vpack.c.bf16 %v342_v9, %v334_v8  ;;  %v348_v18 = vld [vmem:[#allocation5 + $0x388] sm:$0xff] }
  0x6b   : > { %1817 = vmatprep.subr.bf16.mxu1 %v1816_v56  ;;  %v341_v17 = vld [vmem:[#allocation5 + $0x350] sm:$0xff]  ;;  %v356_v19 = vld [vmem:[#allocation5 + $0x3c8] sm:$0xff]  ;;  %v350_v20 = vld [vmem:[#allocation5 + $0x398] sm:$0xff]  ;;  %v1698_v22 = vpack.c.bf16 %v339_v14, %v331_v13 }
  0x6c   : > { %v358_v21 = vld [vmem:[#allocation5 + $0x3d8] sm:$0xff]  ;;  %v1826_v23 = vpack.c.bf16 %v341_v17, %v333_v15  ;;  %v1700_v24 = vpack.c.bf16 %v356_v19, %v348_v18  ;;  %v347_v25 = vld [vmem:[#allocation5 + $0x380] sm:$0xff]  ;;  %v349_v27 = vld [vmem:[#allocation5 + $0x390] sm:$0xff] }
  0x6d   : > { %1691 = vmatpush1.bf16.msra.mxu0 %v1690_v62  ;;  %v355_v26 = vld [vmem:[#allocation5 + $0x3c0] sm:$0xff]  ;;  %v1828_v28 = vpack.c.bf16 %v358_v21, %v350_v20  ;;  %v357_v29 = vld [vmem:[#allocation5 + $0x3d0] sm:$0xff]  ;;  %v364_v30 = vld [vmem:[#allocation5 + $0x408] sm:$0xff] }
  0x6e   : > { %1819 = vmatpush1.bf16.msra.mxu1 %v1818_v63  ;;  %1693 = vmatprep.subr.bf16.mxu0 %v1692_v0  ;;  %v372_v31 = vld [vmem:[#allocation5 + $0x448] sm:$0xff]  ;;  %v366_v32 = vld [vmem:[#allocation5 + $0x418] sm:$0xff]  ;;  %v1702_v34 = vpack.c.bf16 %v355_v26, %v347_v25  ;;  %v1830_v35 = vpack.c.bf16 %v357_v29, %v349_v27  ;;  %v363_v37 = vld [vmem:[#allocation5 + $0x400] sm:$0xff] }
  0x6f   : > { %1821 = vmatprep.subr.bf16.mxu1 %v1820_v4  ;;  %v374_v33 = vld [vmem:[#allocation5 + $0x458] sm:$0xff]  ;;  %v1704_v36 = vpack.c.bf16 %v372_v31, %v364_v30  ;;  %v371_v38 = vld [vmem:[#allocation5 + $0x440] sm:$0xff]  ;;  %v365_v39 = vld [vmem:[#allocation5 + $0x410] sm:$0xff] }
  0x70   : > { %v1832_v40 = vpack.c.bf16 %v374_v33, %v366_v32  ;;  %v373_v41 = vld [vmem:[#allocation5 + $0x450] sm:$0xff]  ;;  %v380_v42 = vld [vmem:[#allocation5 + $0x488] sm:$0xff]  ;;  %v382_v44 = vld [vmem:[#allocation5 + $0x498] sm:$0xff]  ;;  %v1706_v46 = vpack.c.bf16 %v371_v38, %v363_v37 }
  0x71   : > { %1695 = vmatpush1.bf16.msra.mxu0 %v1694_v10  ;;  %v388_v43 = vld [vmem:[#allocation5 + $0x4c8] sm:$0xff]  ;;  %v390_v45 = vld [vmem:[#allocation5 + $0x4d8] sm:$0xff]  ;;  %v1834_v47 = vpack.c.bf16 %v373_v41, %v365_v39  ;;  %v379_v49 = vld [vmem:[#allocation5 + $0x480] sm:$0xff] }
  0x72   : > { %1823 = vmatpush1.bf16.msra.mxu1 %v1822_v11  ;;  %1697 = vmatprep.subr.bf16.mxu0 %v1696_v12  ;;  %v1708_v48 = vpack.c.bf16 %v388_v43, %v380_v42  ;;  %v387_v50 = vld [vmem:[#allocation5 + $0x4c0] sm:$0xff]  ;;  %v381_v51 = vld [vmem:[#allocation5 + $0x490] sm:$0xff]  ;;  %v1836_v52 = vpack.c.bf16 %v390_v45, %v382_v44  ;;  %v396_v54 = vld [vmem:[#allocation5 + $0x508] sm:$0xff] }
  0x73   : > { %1825 = vmatprep.subr.bf16.mxu1 %v1824_v16  ;;  %v389_v53 = vld [vmem:[#allocation5 + $0x4d0] sm:$0xff]  ;;  %v404_v55 = vld [vmem:[#allocation5 + $0x548] sm:$0xff]  ;;  %v398_v56 = vld [vmem:[#allocation5 + $0x518] sm:$0xff]  ;;  %v1710_v58 = vpack.c.bf16 %v387_v50, %v379_v49 }
  0x74   : > { %v406_v57 = vld [vmem:[#allocation5 + $0x558] sm:$0xff]  ;;  %v1838_v59 = vpack.c.bf16 %v389_v53, %v381_v51  ;;  %v1712_v60 = vpack.c.bf16 %v404_v55, %v396_v54  ;;  %v395_v61 = vld [vmem:[#allocation5 + $0x500] sm:$0xff]  ;;  %v397_v63 = vld [vmem:[#allocation5 + $0x510] sm:$0xff] }
  0x75   : > { %1699 = vmatpush1.bf16.msra.mxu0 %v1698_v22  ;;  %v403_v62 = vld [vmem:[#allocation5 + $0x540] sm:$0xff]  ;;  %v1840_v0 = vpack.c.bf16 %v406_v57, %v398_v56  ;;  %v405_v1 = vld [vmem:[#allocation5 + $0x550] sm:$0xff]  ;;  %v412_v2 = vld [vmem:[#allocation5 + $0x588] sm:$0xff] }
  0x76   : > { %1827 = vmatpush1.bf16.msra.mxu1 %v1826_v23  ;;  %1701 = vmatprep.subr.bf16.mxu0 %v1700_v24  ;;  %v420_v3 = vld [vmem:[#allocation5 + $0x5c8] sm:$0xff]  ;;  %v414_v4 = vld [vmem:[#allocation5 + $0x598] sm:$0xff]  ;;  %v1714_v6 = vpack.c.bf16 %v403_v62, %v395_v61  ;;  %v411_v7 = vld [vmem:[#allocation5 + $0x580] sm:$0xff]  ;;  %v1842_v8 = vpack.c.bf16 %v405_v1, %v397_v63 }
  0x77   : > { %1829 = vmatprep.subr.bf16.mxu1 %v1828_v28  ;;  %v422_v5 = vld [vmem:[#allocation5 + $0x5d8] sm:$0xff]  ;;  %v1716_v9 = vpack.c.bf16 %v420_v3, %v412_v2  ;;  %v419_v10 = vld [vmem:[#allocation5 + $0x5c0] sm:$0xff]  ;;  %v413_v11 = vld [vmem:[#allocation5 + $0x590] sm:$0xff] }
  0x78   : > { %v421_v12 = vld [vmem:[#allocation5 + $0x5d0] sm:$0xff]  ;;  %v1844_v13 = vpack.c.bf16 %v422_v5, %v414_v4  ;;  %v428_v14 = vld [vmem:[#allocation5 + $0x608] sm:$0xff]  ;;  %v430_v17 = vld [vmem:[#allocation5 + $0x618] sm:$0xff]  ;;  %v1718_v19 = vpack.c.bf16 %v419_v10, %v411_v7 }
  0x79   : > { %1703 = vmatpush1.bf16.msra.mxu0 %v1702_v34  ;;  %v436_v15 = vld [vmem:[#allocation5 + $0x648] sm:$0xff]  ;;  %v438_v18 = vld [vmem:[#allocation5 + $0x658] sm:$0xff]  ;;  %v1846_v20 = vpack.c.bf16 %v421_v12, %v413_v11  ;;  %v427_v22 = vld [vmem:[#allocation5 + $0x600] sm:$0xff] }
  0x7a   : > { %1831 = vmatpush1.bf16.msra.mxu1 %v1830_v35  ;;  %1705 = vmatprep.subr.bf16.mxu0 %v1704_v36  ;;  %v2646_v16 = vld [vmem:[%s2635_s9 + $0x8] sm:$0xff]  ;;  %v1720_v21 = vpack.c.bf16 %v436_v15, %v428_v14  ;;  %v435_v23 = vld [vmem:[#allocation5 + $0x640] sm:$0xff]  ;;  %v429_v24 = vld [vmem:[#allocation5 + $0x610] sm:$0xff]  ;;  %v1848_v25 = vpack.c.bf16 %v438_v18, %v430_v17 }
  0x7b   : > { %1833 = vmatprep.subr.bf16.mxu1 %v1832_v40  ;;  %811 = vmatprep.mubr.f32.mxu0 %v2646_v16  ;;  %v437_v26 = vld [vmem:[#allocation5 + $0x650] sm:$0xff]  ;;  %v444_v27 = vld [vmem:[#allocation5 + $0x688] sm:$0xff]  ;;  %v446_v29 = vld [vmem:[#allocation5 + $0x698] sm:$0xff]  ;;  %v1722_v31 = vpack.c.bf16 %v435_v23, %v427_v22 }
  0x7c   : > { %989 = vmatprep.mubr.f32.mxu1 %v2646_v16  ;;  %v452_v28 = vld [vmem:[#allocation5 + $0x6c8] sm:$0xff]  ;;  %v454_v30 = vld [vmem:[#allocation5 + $0x6d8] sm:$0xff]  ;;  %v1850_v32 = vpack.c.bf16 %v437_v26, %v429_v24  ;;  %v443_v34 = vld [vmem:[#allocation5 + $0x680] sm:$0xff] }
  0x7d   : > { %1707 = vmatpush1.bf16.msra.mxu0 %v1706_v46  ;;  %v1724_v33 = vpack.c.bf16 %v452_v28, %v444_v27  ;;  %v451_v35 = vld [vmem:[#allocation5 + $0x6c0] sm:$0xff]  ;;  %v445_v36 = vld [vmem:[#allocation5 + $0x690] sm:$0xff]  ;;  %v1852_v37 = vpack.c.bf16 %v454_v30, %v446_v29  ;;  %v460_v39 = vld [vmem:[#allocation5 + $0x708] sm:$0xff] }
  0x7e   : > { %1835 = vmatpush1.bf16.msra.mxu1 %v1834_v47  ;;  %1709 = vmatprep.subr.bf16.mxu0 %v1708_v48  ;;  %v453_v38 = vld [vmem:[#allocation5 + $0x6d0] sm:$0xff]  ;;  %v468_v40 = vld [vmem:[#allocation5 + $0x748] sm:$0xff]  ;;  %v462_v41 = vld [vmem:[#allocation5 + $0x718] sm:$0xff]  ;;  %v1726_v43 = vpack.c.bf16 %v451_v35, %v443_v34 }
  0x7f   : > { %1837 = vmatprep.subr.bf16.mxu1 %v1836_v52  ;;  %v470_v42 = vld [vmem:[#allocation5 + $0x758] sm:$0xff]  ;;  %v1854_v44 = vpack.c.bf16 %v453_v38, %v445_v36  ;;  %v1728_v45 = vpack.c.bf16 %v468_v40, %v460_v39  ;;  %v459_v46 = vld [vmem:[#allocation5 + $0x700] sm:$0xff]  ;;  %v461_v48 = vld [vmem:[#allocation5 + $0x710] sm:$0xff] }
  0x80   : > { %v467_v47 = vld [vmem:[#allocation5 + $0x740] sm:$0xff]  ;;  %v1856_v49 = vpack.c.bf16 %v470_v42, %v462_v41  ;;  %v469_v50 = vld [vmem:[#allocation5 + $0x750] sm:$0xff]  ;;  %v476_v51 = vld [vmem:[#allocation5 + $0x788] sm:$0xff] }
  0x81   : > { %1711 = vmatpush1.bf16.msra.mxu0 %v1710_v58  ;;  %v484_v52 = vld [vmem:[#allocation5 + $0x7c8] sm:$0xff]  ;;  %v478_v53 = vld [vmem:[#allocation5 + $0x798] sm:$0xff]  ;;  %v1730_v55 = vpack.c.bf16 %v467_v47, %v459_v46  ;;  %v1858_v56 = vpack.c.bf16 %v469_v50, %v461_v48  ;;  %v475_v58 = vld [vmem:[#allocation5 + $0x780] sm:$0xff] }
  0x82   : > { %1839 = vmatpush1.bf16.msra.mxu1 %v1838_v59  ;;  %1713 = vmatprep.subr.bf16.mxu0 %v1712_v60  ;;  %v486_v54 = vld [vmem:[#allocation5 + $0x7d8] sm:$0xff]  ;;  %v1732_v57 = vpack.c.bf16 %v484_v52, %v476_v51  ;;  %v483_v59 = vld [vmem:[#allocation5 + $0x7c0] sm:$0xff]  ;;  %v477_v60 = vld [vmem:[#allocation5 + $0x790] sm:$0xff] }
  0x83   : > { %1841 = vmatprep.subr.bf16.mxu1 %v1840_v0  ;;  %v1860_v61 = vpack.c.bf16 %v486_v54, %v478_v53  ;;  %v485_v62 = vld [vmem:[#allocation5 + $0x7d0] sm:$0xff]  ;;  %v492_v63 = vld [vmem:[#allocation5 + $0x808] sm:$0xff]  ;;  %v494_v1 = vld [vmem:[#allocation5 + $0x818] sm:$0xff]  ;;  %v1734_v3 = vpack.c.bf16 %v483_v59, %v475_v58 }
  0x84   : > { %v500_v0 = vld [vmem:[#allocation5 + $0x848] sm:$0xff]  ;;  %v502_v2 = vld [vmem:[#allocation5 + $0x858] sm:$0xff]  ;;  %v1862_v4 = vpack.c.bf16 %v485_v62, %v477_v60  ;;  %v499_v7 = vld [vmem:[#allocation5 + $0x840] sm:$0xff] }
  0x85   : > { %1715 = vmatpush1.bf16.msra.mxu0 %v1714_v6  ;;  %v1736_v5 = vpack.c.bf16 %v500_v0, %v492_v63  ;;  %v491_v6 = vld [vmem:[#allocation5 + $0x800] sm:$0xff]  ;;  %v501_v10 = vld [vmem:[#allocation5 + $0x850] sm:$0xff]  ;;  %v508_v11 = vld [vmem:[#allocation5 + $0x888] sm:$0xff] }
  0x86   : > { %1843 = vmatpush1.bf16.msra.mxu1 %v1842_v8  ;;  %1717 = vmatprep.subr.bf16.mxu0 %v1716_v9  ;;  %v493_v8 = vld [vmem:[#allocation5 + $0x810] sm:$0xff]  ;;  %v1864_v9 = vpack.c.bf16 %v502_v2, %v494_v1  ;;  %v516_v12 = vld [vmem:[#allocation5 + $0x8c8] sm:$0xff]  ;;  %v518_v14 = vld [vmem:[#allocation5 + $0x8d8] sm:$0xff]  ;;  %v1738_v17 = vpack.c.bf16 %v499_v7, %v491_v6 }
  0x87   : > { %1845 = vmatprep.subr.bf16.mxu1 %v1844_v13  ;;  %v510_v13 = vld [vmem:[#allocation5 + $0x898] sm:$0xff]  ;;  %v219_v15 = vld [vmem:[%s2635_s9] sm:$0xff]  ;;  %v1866_v18 = vpack.c.bf16 %v501_v10, %v493_v8  ;;  %v509_v22 = vld [vmem:[#allocation5 + $0x890] sm:$0xff] }
  0x88   : > { %v1868_v23 = vpack.c.bf16 %v518_v14, %v510_v13  ;;  %v517_v24 = vld [vmem:[#allocation5 + $0x8d0] sm:$0xff]  ;;  %v532_v26 = vld [vmem:[#allocation5 + $0x948] sm:$0xff]  ;;  %v526_v27 = vld [vmem:[#allocation5 + $0x918] sm:$0xff] }
  0x89   : > { %1719 = vmatpush1.bf16.msra.mxu0 %v1718_v19  ;;  %v1740_v19 = vpack.c.bf16 %v516_v12, %v508_v11  ;;  %v534_v28 = vld [vmem:[#allocation5 + $0x958] sm:$0xff]  ;;  %v1870_v30 = vpack.c.bf16 %v517_v24, %v509_v22  ;;  %v525_v34 = vld [vmem:[#allocation5 + $0x910] sm:$0xff]  ;;  %v548_v38 = vld [vmem:[#allocation5 + $0x9c8] sm:$0xff] }
  0x8a   : > { %1847 = vmatpush1.bf16.msra.mxu1 %v1846_v20  ;;  %1721 = vmatprep.subr.bf16.mxu0 %v1720_v21  ;;  %v507_v20 = vld [vmem:[#allocation5 + $0x880] sm:$0xff]  ;;  %v1872_v35 = vpack.c.bf16 %v534_v28, %v526_v27  ;;  %v533_v36 = vld [vmem:[#allocation5 + $0x950] sm:$0xff]  ;;  %v542_v39 = vld [vmem:[#allocation5 + $0x998] sm:$0xff] }
  0x8b   : > { %1849 = vmatprep.subr.bf16.mxu1 %v1848_v25  ;;  %v515_v21 = vld [vmem:[#allocation5 + $0x8c0] sm:$0xff]  ;;  %v524_v25 = vld [vmem:[#allocation5 + $0x908] sm:$0xff]  ;;  %v550_v40 = vld [vmem:[#allocation5 + $0x9d8] sm:$0xff]  ;;  %v1874_v42 = vpack.c.bf16 %v533_v36, %v525_v34 }
  0x8c   : > { %v1742_v29 = vpack.c.bf16 %v515_v21, %v507_v20  ;;  %v541_v46 = vld [vmem:[#allocation5 + $0x990] sm:$0xff]  ;;  %v1876_v47 = vpack.c.bf16 %v550_v40, %v542_v39  ;;  %v564_v50 = vld [vmem:[#allocation5 + $0xa48] sm:$0xff]  ;;  %v558_v51 = vld [vmem:[#allocation5 + $0xa18] sm:$0xff] }
  0x8d   : > { %1723 = vmatpush1.bf16.msra.mxu0 %v1722_v31  ;;  %v1744_v31 = vpack.c.bf16 %v532_v26, %v524_v25  ;;  %v549_v48 = vld [vmem:[#allocation5 + $0x9d0] sm:$0xff]  ;;  %v566_v52 = vld [vmem:[#allocation5 + $0xa58] sm:$0xff]  ;;  %v555_v54 = vld [vmem:[#allocation5 + $0xa00] sm:$0xff] }
  0x8e   : > { %1851 = vmatpush1.bf16.msra.mxu1 %v1850_v32  ;;  %1725 = vmatprep.subr.bf16.mxu0 %v1724_v33  ;;  %v523_v32 = vld [vmem:[#allocation5 + $0x900] sm:$0xff]  ;;  %v557_v58 = vld [vmem:[#allocation5 + $0xa10] sm:$0xff]  ;;  %v572_v60 = vld [vmem:[#allocation5 + $0xa88] sm:$0xff] }
  0x8f   : > { %1853 = vmatprep.subr.bf16.mxu1 %v1852_v37  ;;  %v531_v33 = vld [vmem:[#allocation5 + $0x940] sm:$0xff]  ;;  %v540_v37 = vld [vmem:[#allocation5 + $0x988] sm:$0xff]  ;;  %v565_v59 = vld [vmem:[#allocation5 + $0xa50] sm:$0xff] }
  0x90   : > { %v1746_v41 = vpack.c.bf16 %v531_v33, %v523_v32  ;;  %v580_v62 = vld [vmem:[#allocation5 + $0xac8] sm:$0xff]  ;;  %v223_v0 = vld [vmem:[%s2635_s9 + $0x20] sm:$0xff]  ;;  %v574_v1 = vld [vmem:[#allocation5 + $0xa98] sm:$0xff]  ;;  %v1882_v6 = vpack.c.bf16 %v565_v59, %v557_v58 }
  0x91   : > { %1727 = vmatpush1.bf16.msra.mxu0 %v1726_v43  ;;  %v1748_v43 = vpack.c.bf16 %v548_v38, %v540_v37  ;;  %v224_v63 = vld [vmem:[%s2635_s9 + $0x28] sm:$0xff]  ;;  %v582_v2 = vld [vmem:[#allocation5 + $0xad8] sm:$0xff]  ;;  %v1756_v7 = vpack.c.bf16 %v580_v62, %v572_v60  ;;  %v573_v8 = vld [vmem:[#allocation5 + $0xa90] sm:$0xff] }
  0x92   : > { %1855 = vmatpush1.bf16.msra.mxu1 %v1854_v44  ;;  %1729 = vmatprep.subr.bf16.mxu0 %v1728_v45  ;;  %v539_v44 = vld [vmem:[#allocation5 + $0x980] sm:$0xff]  ;;  %v1884_v11 = vpack.c.bf16 %v582_v2, %v574_v1  ;;  %v581_v12 = vld [vmem:[#allocation5 + $0xad0] sm:$0xff]  ;;  %v588_v13 = vld [vmem:[#allocation5 + $0xb08] sm:$0xff] }
  0x93   : > { %1857 = vmatprep.subr.bf16.mxu1 %v1856_v49  ;;  %v547_v45 = vld [vmem:[#allocation5 + $0x9c0] sm:$0xff]  ;;  %v556_v49 = vld [vmem:[#allocation5 + $0xa08] sm:$0xff]  ;;  %v1886_v21 = vpack.c.bf16 %v581_v12, %v573_v8  ;;  %v589_v24 = vld [vmem:[#allocation5 + $0xb10] sm:$0xff] }
  0x94   : > { %v1750_v53 = vpack.c.bf16 %v547_v45, %v539_v44  ;;  %v227_v10 = vld [vmem:[%s2635_s9 + $0x40] sm:$0xff]  ;;  %v596_v14 = vld [vmem:[#allocation5 + $0xb48] sm:$0xff]  ;;  %v597_v27 = vld [vmem:[#allocation5 + $0xb50] sm:$0xff] }
  0x95   : > { %1731 = vmatpush1.bf16.msra.mxu0 %v1730_v55  ;;  %v563_v55 = vld [vmem:[#allocation5 + $0xa40] sm:$0xff]  ;;  %v232_v20 = vld [vmem:[%s2635_s9 + $0x68] sm:$0xff]  ;;  %v1760_v22 = vpack.c.bf16 %v596_v14, %v588_v13  ;;  %v222_v33 = vld [vmem:[%s2635_s9 + $0x18] sm:$0xff]  ;;  %v1890_v34 = vpack.c.bf16 %v597_v27, %v589_v24 }
  0x96   : > { %1859 = vmatpush1.bf16.msra.mxu1 %v1858_v56  ;;  %1733 = vmatprep.subr.bf16.mxu0 %v1732_v57  ;;  %v1878_v56 = vpack.c.bf16 %v549_v48, %v541_v46  ;;  %v1752_v57 = vpack.c.bf16 %v564_v50, %v556_v49  ;;  %v231_v25 = vld [vmem:[%s2635_s9 + $0x60] sm:$0xff]  ;;  %v604_v28 = vld [vmem:[#allocation5 + $0xb88] sm:$0xff]  ;;  %v605_v38 = vld [vmem:[#allocation5 + $0xb90] sm:$0xff] }
  0x97   : > { %1861 = vmatprep.subr.bf16.mxu1 %v1860_v61  ;;  %v1880_v61 = vpack.c.bf16 %v566_v52, %v558_v51  ;;  %v603_v36 = vld [vmem:[#allocation5 + $0xb80] sm:$0xff]  ;;  %v613_v40 = vld [vmem:[#allocation5 + $0xbd0] sm:$0xff]  ;;  %v630_v44 = vld [vmem:[#allocation5 + $0xc58] sm:$0xff] }
  0x98   : > { %v611_v37 = vld [vmem:[#allocation5 + $0xbc0] sm:$0xff]  ;;  %v1894_v46 = vpack.c.bf16 %v613_v40, %v605_v38  ;;  %v621_v50 = vld [vmem:[#allocation5 + $0xc10] sm:$0xff]  ;;  %v652_v1 = vld [vmem:[#allocation5 + $0xd08] sm:$0xff] }
  0x99   : > { %1735 = vmatpush1.bf16.msra.mxu0 %v1734_v3  ;;  %v1754_v3 = vpack.c.bf16 %v563_v55, %v555_v54  ;;  %v1766_v45 = vpack.c.bf16 %v611_v37, %v603_v36  ;;  %v619_v48 = vld [vmem:[#allocation5 + $0xc00] sm:$0xff]  ;;  %v629_v52 = vld [vmem:[#allocation5 + $0xc50] sm:$0xff]  ;;  %v644_v54 = vld [vmem:[#allocation5 + $0xcc8] sm:$0xff] }
  0x9a   : > { %1863 = vmatpush1.bf16.msra.mxu1 %v1862_v4  ;;  %1737 = vmatprep.subr.bf16.mxu0 %v1736_v5  ;;  %v571_v4 = vld [vmem:[#allocation5 + $0xa80] sm:$0xff]  ;;  %v638_v55 = vld [vmem:[#allocation5 + $0xc98] sm:$0xff]  ;;  %v1898_v58 = vpack.c.bf16 %v629_v52, %v621_v50  ;;  %v637_v62 = vld [vmem:[#allocation5 + $0xc90] sm:$0xff] }
  0x9b   : > { %1865 = vmatprep.subr.bf16.mxu1 %v1864_v9  ;;  %v579_v5 = vld [vmem:[#allocation5 + $0xac0] sm:$0xff]  ;;  %v228_v9 = vld [vmem:[%s2635_s9 + $0x48] sm:$0xff]  ;;  %v661_v12 = vld [vmem:[#allocation5 + $0xd50] sm:$0xff] }
  0x9c   : > { %812 = vmatmul.mubr.f32.vlgmr.msra.gmra.mrb[0].mxu0 %v219_v15  ;;  %v627_v49 = vld [vmem:[#allocation5 + $0xc40] sm:$0xff]  ;;  %v660_v2 = vld [vmem:[#allocation5 + $0xd48] sm:$0xff]  ;;  %v693_v37 = vld [vmem:[#allocation5 + $0xe50] sm:$0xff] }
  0x9d   : > { %1739 = vmatpush1.bf16.msra.mxu0 %v1738_v17  ;;  %990 = vmatmul.mubr.f32.vlgmr.msra.gmra.mrb[0].mxu1 %v219_v15  ;;  %v590_v15 = vld [vmem:[#allocation5 + $0xb18] sm:$0xff]  ;;  %v635_v60 = vld [vmem:[#allocation5 + $0xc80] sm:$0xff]  ;;  %v668_v13 = vld [vmem:[#allocation5 + $0xd88] sm:$0xff] }
  0x9e   : > { %1867 = vmatpush1.bf16.msra.mxu1 %v1866_v18  ;;  %1741 = vmatprep.subr.bf16.mxu0 %v1740_v19  ;;  %v598_v17 = vld [vmem:[#allocation5 + $0xb58] sm:$0xff]  ;;  %v1758_v18 = vpack.c.bf16 %v579_v5, %v571_v4  ;;  %v587_v19 = vld [vmem:[#allocation5 + $0xb00] sm:$0xff]  ;;  %v676_v14 = vld [vmem:[#allocation5 + $0xdc8] sm:$0xff] }
  0x9f   : > { %1869 = vmatprep.subr.bf16.mxu1 %v1868_v23  ;;  %817 = vmatprep.mubr.f32.mxu0 %v224_v63  ;;  %v595_v23 = vld [vmem:[#allocation5 + $0xb40] sm:$0xff]  ;;  %v1888_v26 = vpack.c.bf16 %v598_v17, %v590_v15  ;;  %v662_v4 = vld [vmem:[#allocation5 + $0xd58] sm:$0xff]  ;;  %v692_v27 = vld [vmem:[#allocation5 + $0xe48] sm:$0xff] }
  0xa0   : > { %995 = vmatprep.mubr.f32.mxu1 %v224_v63  ;;  %818 = vmatmul.mubr.f32.gmra.mrb[2].mxu0 %v223_v0  ;;  %v1762_v32 = vpack.c.bf16 %v595_v23, %v587_v19  ;;  %v651_v8 = vld [vmem:[#allocation5 + $0xd00] sm:$0xff]  ;;  %v670_v15 = vld [vmem:[#allocation5 + $0xd98] sm:$0xff]  ;;  %v669_v23 = vld [vmem:[#allocation5 + $0xd90] sm:$0xff] }
  0xa1   : > { %1743 = vmatpush1.bf16.msra.mxu0 %v1742_v29  ;;  %996 = vmatmul.mubr.f32.gmra.mrb[2].mxu1 %v223_v0  ;;  %v612_v29 = vld [vmem:[#allocation5 + $0xbc8] sm:$0xff]  ;;  %v645_v0 = vld [vmem:[#allocation5 + $0xcd0] sm:$0xff]  ;;  %v678_v17 = vld [vmem:[#allocation5 + $0xdd8] sm:$0xff] }
  0xa2   : > { %1871 = vmatpush1.bf16.msra.mxu1 %v1870_v30  ;;  %1745 = vmatprep.subr.bf16.mxu0 %v1744_v31  ;;  %v606_v30 = vld [vmem:[#allocation5 + $0xb98] sm:$0xff]  ;;  %v1908_v24 = vpack.c.bf16 %v678_v17, %v670_v15  ;;  %v700_v38 = vld [vmem:[#allocation5 + $0xe88] sm:$0xff] }
  0xa3   : > { %1873 = vmatprep.subr.bf16.mxu1 %v1872_v35  ;;  %823 = vmatprep.mubr.f32.mxu0 %v228_v9  ;;  %v614_v31 = vld [vmem:[#allocation5 + $0xbd8] sm:$0xff]  ;;  %v1764_v35 = vpack.c.bf16 %v612_v29, %v604_v28  ;;  %v716_v50 = vld [vmem:[#allocation5 + $0xf08] sm:$0xff] }
  0xa4   : > { %1001 = vmatprep.mubr.f32.mxu1 %v228_v9  ;;  %824 = vmatmul.mubr.f32.gmra.mrb[4].mxu0 %v227_v10  ;;  %v1892_v39 = vpack.c.bf16 %v614_v31, %v606_v30  ;;  %v659_v9 = vld [vmem:[#allocation5 + $0xd40] sm:$0xff]  ;;  %v686_v28 = vld [vmem:[#allocation5 + $0xe18] sm:$0xff] }
  0xa5   : > { %1747 = vmatpush1.bf16.msra.mxu0 %v1746_v41  ;;  %1002 = vmatmul.mubr.f32.gmra.mrb[4].mxu1 %v227_v10  ;;  %v620_v41 = vld [vmem:[#allocation5 + $0xc08] sm:$0xff]  ;;  %v653_v10 = vld [vmem:[#allocation5 + $0xd10] sm:$0xff]  ;;  %v694_v29 = vld [vmem:[#allocation5 + $0xe58] sm:$0xff] }
  0xa6   : > { %1875 = vmatpush1.bf16.msra.mxu1 %v1874_v42  ;;  %1749 = vmatprep.subr.bf16.mxu0 %v1748_v43  ;;  %v628_v42 = vld [vmem:[#allocation5 + $0xc48] sm:$0xff]  ;;  %v622_v43 = vld [vmem:[#allocation5 + $0xc18] sm:$0xff]  ;;  %v1906_v19 = vpack.c.bf16 %v661_v12, %v653_v10  ;;  %v1912_v36 = vpack.c.bf16 %v694_v29, %v686_v28 }
  0xa7   : > { %1877 = vmatprep.subr.bf16.mxu1 %v1876_v47  ;;  %829 = vmatprep.mubr.f32.mxu0 %v232_v20  ;;  %v1768_v47 = vpack.c.bf16 %v628_v42, %v620_v41  ;;  %v1896_v51 = vpack.c.bf16 %v630_v44, %v622_v43  ;;  %v702_v40 = vld [vmem:[#allocation5 + $0xe98] sm:$0xff]  ;;  %v240_v10 = vld [vmem:[#allocation5 + $0x28] sm:$0xff] }
  0xa8   : > { %1007 = vmatprep.mubr.f32.mxu1 %v232_v20  ;;  %830 = vmatmul.mubr.f32.gmra.mrb[6].mxu0 %v231_v25  ;;  %v1780_v20 = vpack.c.bf16 %v676_v14, %v668_v13  ;;  %v710_v41 = vld [vmem:[#allocation5 + $0xed8] sm:$0xff] }
  0xa9   : > { %1751 = vmatpush1.bf16.msra.mxu0 %v1750_v53  ;;  %1008 = vmatmul.mubr.f32.gmra.mrb[6].mxu1 %v231_v25  ;;  %v636_v53 = vld [vmem:[#allocation5 + $0xc88] sm:$0xff]  ;;  %v677_v25 = vld [vmem:[#allocation5 + $0xdd0] sm:$0xff]  ;;  %v718_v52 = vld [vmem:[#allocation5 + $0xf18] sm:$0xff] }
  0xaa   : > { %1879 = vmatpush1.bf16.msra.mxu1 %v1878_v56  ;;  %1753 = vmatprep.subr.bf16.mxu0 %v1752_v57  ;;  %v646_v56 = vld [vmem:[#allocation5 + $0xcd8] sm:$0xff]  ;;  %v1770_v57 = vpack.c.bf16 %v627_v49, %v619_v48  ;;  %v1772_v59 = vpack.c.bf16 %v644_v54, %v636_v53  ;;  %v1910_v31 = vpack.c.bf16 %v677_v25, %v669_v23  ;;  %v709_v49 = vld [vmem:[#allocation5 + $0xed0] sm:$0xff]  ;;  %v256_v23 = vld [vmem:[#allocation5 + $0xa8] sm:$0xff] }
  0xab   : > { %1881 = vmatprep.subr.bf16.mxu1 %v1880_v61  ;;  %900 = vmatprep.mubr.f32.mxu0 %v222_v33  ;;  %v643_v61 = vld [vmem:[#allocation5 + $0xcc0] sm:$0xff]  ;;  %v1900_v63 = vpack.c.bf16 %v646_v56, %v638_v55  ;;  %v1916_v48 = vpack.c.bf16 %v710_v41, %v702_v40  ;;  %v726_v53 = vld [vmem:[#allocation5 + $0xf58] sm:$0xff]  ;;  %v221_v25 = vld [vmem:[%s2635_s9 + $0x10] sm:$0xff] }
  0xac   : > { %1078 = vmatprep.mubr.f32.mxu1 %v222_v33  ;;  %v1774_v5 = vpack.c.bf16 %v643_v61, %v635_v60  ;;  %v683_v33 = vld [vmem:[#allocation5 + $0xe00] sm:$0xff]  ;;  %v1920_v60 = vpack.c.bf16 %v726_v53, %v718_v52  ;;  %v725_v61 = vld [vmem:[#allocation5 + $0xf50] sm:$0xff]  ;;  %v242_v12 = vld [vmem:[#allocation5 + $0x38] sm:$0xff] }
  0xad   : > { %1755 = vmatpush1.bf16.msra.mxu0 %v1754_v3  ;;  %v654_v3 = vld [vmem:[#allocation5 + $0xd18] sm:$0xff]  ;;  %v288_v52 = vld [vmem:[#allocation5 + $0x1a8] sm:$0xff] }
  0xae   : > { %1883 = vmatpush1.bf16.msra.mxu1 %v1882_v6  ;;  %1757 = vmatprep.subr.bf16.mxu0 %v1756_v7  ;;  %v1902_v6 = vpack.c.bf16 %v645_v0, %v637_v62  ;;  %v1776_v7 = vpack.c.bf16 %v660_v2, %v652_v1  ;;  %v732_v62 = vld [vmem:[#allocation5 + $0xf88] sm:$0xff]  ;;  %v734_v0 = vld [vmem:[#allocation5 + $0xf98] sm:$0xff] }
  0xaf   : > { %1885 = vmatprep.subr.bf16.mxu1 %v1884_v11  ;;  %v1904_v11 = vpack.c.bf16 %v662_v4, %v654_v3  ;;  %v742_v1 = vld [vmem:[#allocation5 + $0xfd8] sm:$0xff]  ;;  %v296_v53 = vld [vmem:[#allocation5 + $0x1e8] sm:$0xff] }
  0xb0   : > { %v250_v13 = vld [vmem:[#allocation5 + $0x78] sm:$0xff] }
  0xb1   : > { %1759 = vmatpush1.bf16.msra.mxu0 %v1758_v18  ;;  %v1778_v18 = vpack.c.bf16 %v659_v9, %v651_v8  ;;  %v1924_v8 = vpack.c.bf16 %v742_v1, %v734_v0  ;;  %v741_v9 = vld [vmem:[#allocation5 + $0xfd0] sm:$0xff]  ;;  %v266_v28 = vld [vmem:[#allocation5 + $0xf8] sm:$0xff]  ;;  %v304_v0 = vld [vmem:[#allocation5 + $0x228] sm:$0xff] }
  0xb2   : > { %1887 = vmatpush1.bf16.msra.mxu1 %v1886_v21  ;;  %1761 = vmatprep.subr.bf16.mxu0 %v1760_v22  ;;  %v667_v21 = vld [vmem:[#allocation5 + $0xd80] sm:$0xff]  ;;  %v274_v41 = vld [vmem:[#allocation5 + $0x138] sm:$0xff]  ;;  %v312_v1 = vld [vmem:[#allocation5 + $0x268] sm:$0xff] }
  0xb3   : > { %1889 = vmatprep.subr.bf16.mxu1 %v1888_v26  ;;  %v675_v22 = vld [vmem:[#allocation5 + $0xdc0] sm:$0xff]  ;;  %v684_v26 = vld [vmem:[#allocation5 + $0xe08] sm:$0xff] }
  0xb4   : > { %v1782_v30 = vpack.c.bf16 %v675_v22, %v667_v21  ;;  %v241_v21 = vld [vmem:[#allocation5 + $0x30] sm:$0xff] }
  0xb5   : > { %1763 = vmatpush1.bf16.msra.mxu0 %v1762_v32  ;;  %v1784_v32 = vpack.c.bf16 %v692_v27, %v684_v26  ;;  %v249_v22 = vld [vmem:[#allocation5 + $0x70] sm:$0xff]  ;;  %v258_v27 = vld [vmem:[#allocation5 + $0xb8] sm:$0xff] }
  0xb6   : > { %1891 = vmatpush1.bf16.msra.mxu1 %v1890_v34  ;;  %1765 = vmatprep.subr.bf16.mxu0 %v1764_v35  ;;  %v691_v34 = vld [vmem:[#allocation5 + $0xe40] sm:$0xff]  ;;  %v685_v35 = vld [vmem:[#allocation5 + $0xe10] sm:$0xff]  ;;  %v2058_v29 = vpack.c.bf16 %v249_v22, %v241_v21 }
  0xb7   : > { %1893 = vmatprep.subr.bf16.mxu1 %v1892_v39  ;;  %v708_v39 = vld [vmem:[#allocation5 + $0xec8] sm:$0xff]  ;;  %v1786_v42 = vpack.c.bf16 %v691_v34, %v683_v33  ;;  %v1914_v43 = vpack.c.bf16 %v693_v37, %v685_v35  ;;  %v257_v34 = vld [vmem:[#allocation5 + $0xb0] sm:$0xff]  ;;  %v319_v22 = vld [vmem:[#allocation5 + $0x2a0] sm:$0xff] }
  0xb8   : > { %v1788_v44 = vpack.c.bf16 %v708_v39, %v700_v38  ;;  %v265_v35 = vld [vmem:[#allocation5 + $0xf0] sm:$0xff]  ;;  %v272_v37 = vld [vmem:[#allocation5 + $0x128] sm:$0xff] }
  0xb9   : > { %1767 = vmatpush1.bf16.msra.mxu0 %v1766_v45  ;;  %v699_v45 = vld [vmem:[#allocation5 + $0xe80] sm:$0xff]  ;;  %v280_v38 = vld [vmem:[#allocation5 + $0x168] sm:$0xff]  ;;  %v225_v39 = vld [vmem:[%s2635_s9 + $0x30] sm:$0xff] }
  0xba   : > { %1895 = vmatpush1.bf16.msra.mxu1 %v1894_v46  ;;  %1769 = vmatprep.subr.bf16.mxu0 %v1768_v47  ;;  %v707_v46 = vld [vmem:[#allocation5 + $0xec0] sm:$0xff]  ;;  %v701_v47 = vld [vmem:[#allocation5 + $0xe90] sm:$0xff] }
  0xbb   : > { %1897 = vmatprep.subr.bf16.mxu1 %v1896_v51  ;;  %v724_v51 = vld [vmem:[#allocation5 + $0xf48] sm:$0xff]  ;;  %v1790_v54 = vpack.c.bf16 %v707_v46, %v699_v45  ;;  %v1918_v55 = vpack.c.bf16 %v709_v49, %v701_v47  ;;  %v279_v45 = vld [vmem:[#allocation5 + $0x160] sm:$0xff]  ;;  %v230_v46 = vld [vmem:[%s2635_s9 + $0x58] sm:$0xff]  ;;  %v1936_v47 = vpack.c.bf16 %v280_v38, %v272_v37 }
  0xbc   : > { %v1792_v56 = vpack.c.bf16 %v724_v51, %v716_v50  ;;  %v281_v49 = vld [vmem:[#allocation5 + $0x170] sm:$0xff] }
  0xbd   : > { %1771 = vmatpush1.bf16.msra.mxu0 %v1770_v57  ;;  %v715_v57 = vld [vmem:[#allocation5 + $0xf00] sm:$0xff]  ;;  %v2663_v50 = vld [vmem:[%s2635_s9 + $0x50] sm:$0xff] }
  0xbe   : > { %1899 = vmatpush1.bf16.msra.mxu1 %v1898_v58  ;;  %1773 = vmatprep.subr.bf16.mxu0 %v1772_v59  ;;  %v723_v58 = vld [vmem:[#allocation5 + $0xf40] sm:$0xff]  ;;  %v717_v59 = vld [vmem:[#allocation5 + $0xf10] sm:$0xff] }
  0xbf   : > { %1901 = vmatprep.subr.bf16.mxu1 %v1900_v63  ;;  %v740_v63 = vld [vmem:[#allocation5 + $0xfc8] sm:$0xff]  ;;  %v1794_v2 = vpack.c.bf16 %v723_v58, %v715_v57  ;;  %v1922_v3 = vpack.c.bf16 %v725_v61, %v717_v59  ;;  %v298_v57 = vld [vmem:[#allocation5 + $0x1f8] sm:$0xff]  ;;  %v287_v59 = vld [vmem:[#allocation5 + $0x1a0] sm:$0xff] }
  0xc0   : > { %v1796_v4 = vpack.c.bf16 %v740_v63, %v732_v62  ;;  %v289_v61 = vld [vmem:[#allocation5 + $0x1b0] sm:$0xff]  ;;  %v1940_v62 = vpack.c.bf16 %v296_v53, %v288_v52  ;;  %v376_v52 = vld [vmem:[#allocation5 + $0x468] sm:$0xff]  ;;  %v370_v53 = vld [vmem:[#allocation5 + $0x438] sm:$0xff] }
  0xc1   : > { %1775 = vmatpush1.bf16.msra.mxu0 %v1774_v5  ;;  %v731_v5 = vld [vmem:[#allocation5 + $0xf80] sm:$0xff]  ;;  %v297_v63 = vld [vmem:[#allocation5 + $0x1f0] sm:$0xff] }
  0xc2   : > { %1903 = vmatpush1.bf16.msra.mxu1 %v1902_v6  ;;  %1777 = vmatprep.subr.bf16.mxu0 %v1776_v7  ;;  %v739_v6 = vld [vmem:[#allocation5 + $0xfc0] sm:$0xff]  ;;  %v733_v7 = vld [vmem:[#allocation5 + $0xf90] sm:$0xff] }
  0xc3   : > { %1905 = vmatprep.subr.bf16.mxu1 %v1904_v11  ;;  %v248_v11 = vld [vmem:[#allocation5 + $0x68] sm:$0xff]  ;;  %v1798_v14 = vpack.c.bf16 %v739_v6, %v731_v5  ;;  %v1926_v15 = vpack.c.bf16 %v741_v9, %v733_v7  ;;  %v2671_v5 = vld [vmem:[%s2635_s9 + $0x70] sm:$0xff]  ;;  %v2070_v7 = vpack.c.bf16 %v297_v63, %v289_v61  ;;  %v303_v9 = vld [vmem:[#allocation5 + $0x220] sm:$0xff] }
  0xc4   : > { %v1928_v17 = vpack.c.bf16 %v248_v11, %v240_v10  ;;  %v311_v10 = vld [vmem:[#allocation5 + $0x260] sm:$0xff]  ;;  %v305_v11 = vld [vmem:[#allocation5 + $0x230] sm:$0xff] }
  0xc5   : > { %1779 = vmatpush1.bf16.msra.mxu0 %v1778_v18  ;;  %v239_v18 = vld [vmem:[#allocation5 + $0x20] sm:$0xff]  ;;  %v345_v38 = vld [vmem:[#allocation5 + $0x370] sm:$0xff] }
  0xc6   : > { %1907 = vmatpush1.bf16.msra.mxu1 %v1906_v19  ;;  %1781 = vmatprep.subr.bf16.mxu0 %v1780_v20  ;;  %v247_v19 = vld [vmem:[#allocation5 + $0x60] sm:$0xff]  ;;  %v2056_v20 = vpack.c.bf16 %v250_v13, %v242_v12  ;;  %v313_v13 = vld [vmem:[#allocation5 + $0x270] sm:$0xff] }
  0xc7   : > { %1909 = vmatprep.subr.bf16.mxu1 %v1908_v24  ;;  %v264_v24 = vld [vmem:[#allocation5 + $0xe8] sm:$0xff]  ;;  %v1930_v26 = vpack.c.bf16 %v247_v19, %v239_v18  ;;  %v330_v18 = vld [vmem:[#allocation5 + $0x2f8] sm:$0xff]  ;;  %v1946_v19 = vpack.c.bf16 %v311_v10, %v303_v9  ;;  %v369_v61 = vld [vmem:[#allocation5 + $0x430] sm:$0xff] }
  0xc8   : > { %v1932_v33 = vpack.c.bf16 %v264_v24, %v256_v23  ;;  %v327_v23 = vld [vmem:[#allocation5 + $0x2e0] sm:$0xff]  ;;  %v321_v24 = vld [vmem:[#allocation5 + $0x2b0] sm:$0xff] }
  0xc9   : > { %1783 = vmatpush1.bf16.msra.mxu0 %v1782_v30  ;;  %v255_v30 = vld [vmem:[#allocation5 + $0xa0] sm:$0xff]  ;;  %v377_v63 = vld [vmem:[#allocation5 + $0x470] sm:$0xff] }
  0xca   : > { %1911 = vmatpush1.bf16.msra.mxu1 %v1910_v31  ;;  %1785 = vmatprep.subr.bf16.mxu0 %v1784_v32  ;;  %v263_v31 = vld [vmem:[#allocation5 + $0xe0] sm:$0xff]  ;;  %v226_v32 = vld [vmem:[%s2635_s9 + $0x38] sm:$0xff]  ;;  %v385_v10 = vld [vmem:[#allocation5 + $0x4b0] sm:$0xff] }
  0xcb   : > { %1913 = vmatprep.subr.bf16.mxu1 %v1912_v36  ;;  %v2060_v36 = vpack.c.bf16 %v266_v28, %v258_v27  ;;  %v1934_v40 = vpack.c.bf16 %v263_v31, %v255_v30  ;;  %v336_v27 = vld [vmem:[#allocation5 + $0x328] sm:$0xff]  ;;  %v346_v30 = vld [vmem:[#allocation5 + $0x378] sm:$0xff]  ;;  %v1950_v31 = vpack.c.bf16 %v327_v23, %v319_v22  ;;  %v391_v9 = vld [vmem:[#allocation5 + $0x4e0] sm:$0xff] }
  0xcc   : > { %v344_v28 = vld [vmem:[#allocation5 + $0x368] sm:$0xff]  ;;  %v407_v22 = vld [vmem:[#allocation5 + $0x560] sm:$0xff]  ;;  %v401_v23 = vld [vmem:[#allocation5 + $0x530] sm:$0xff] }
  0xcd   : > { %1787 = vmatpush1.bf16.msra.mxu0 %v1786_v42  ;;  %v282_v42 = vld [vmem:[#allocation5 + $0x178] sm:$0xff] }
  0xce   : > { %1915 = vmatpush1.bf16.msra.mxu1 %v1914_v43  ;;  %1789 = vmatprep.subr.bf16.mxu0 %v1788_v44  ;;  %v2062_v43 = vpack.c.bf16 %v265_v35, %v257_v34  ;;  %v271_v44 = vld [vmem:[#allocation5 + $0x120] sm:$0xff]  ;;  %v2064_v51 = vpack.c.bf16 %v282_v42, %v274_v41  ;;  %v354_v41 = vld [vmem:[#allocation5 + $0x3b8] sm:$0xff] }
  0xcf   : > { %1917 = vmatprep.subr.bf16.mxu1 %v1916_v48  ;;  %v273_v48 = vld [vmem:[#allocation5 + $0x130] sm:$0xff]  ;;  %v335_v34 = vld [vmem:[#allocation5 + $0x320] sm:$0xff]  ;;  %v362_v42 = vld [vmem:[#allocation5 + $0x3f8] sm:$0xff] }
  0xd0   : > { %v2066_v58 = vpack.c.bf16 %v281_v49, %v273_v48  ;;  %v343_v35 = vld [vmem:[#allocation5 + $0x360] sm:$0xff]  ;;  %v2084_v48 = vpack.c.bf16 %v362_v42, %v354_v41  ;;  %v361_v49 = vld [vmem:[#allocation5 + $0x3f0] sm:$0xff]  ;;  %v442_v41 = vld [vmem:[#allocation5 + $0x678] sm:$0xff] }
  0xd1   : > { %1791 = vmatpush1.bf16.msra.mxu0 %v1790_v54  ;;  %v1938_v54 = vpack.c.bf16 %v279_v45, %v271_v44  ;;  %v351_v45 = vld [vmem:[#allocation5 + $0x3a0] sm:$0xff] }
  0xd2   : > { %1919 = vmatpush1.bf16.msra.mxu1 %v1918_v55  ;;  %1793 = vmatprep.subr.bf16.mxu0 %v1792_v56  ;;  %v2666_v55 = vld [vmem:[%s2635_s9 + $0x78] sm:$0xff] }
  0xd3   : > { %1921 = vmatprep.subr.bf16.mxu1 %v1920_v60  ;;  %v290_v56 = vld [vmem:[#allocation5 + $0x1b8] sm:$0xff]  ;;  %v295_v60 = vld [vmem:[#allocation5 + $0x1e0] sm:$0xff] }
  0xd4   : > { %v1942_v6 = vpack.c.bf16 %v295_v60, %v287_v59  ;;  %v367_v59 = vld [vmem:[#allocation5 + $0x420] sm:$0xff] }
  0xd5   : > { %1795 = vmatpush1.bf16.msra.mxu0 %v1794_v2  ;;  %v2068_v2 = vpack.c.bf16 %v298_v57, %v290_v56  ;;  %v375_v60 = vld [vmem:[#allocation5 + $0x460] sm:$0xff] }
  0xd6   : > { %1923 = vmatpush1.bf16.msra.mxu1 %v1922_v3  ;;  %1797 = vmatprep.subr.bf16.mxu0 %v1796_v4  ;;  %v306_v3 = vld [vmem:[#allocation5 + $0x238] sm:$0xff] }
  0xd7   : > { %1925 = vmatprep.subr.bf16.mxu1 %v1924_v8  ;;  %v314_v4 = vld [vmem:[#allocation5 + $0x278] sm:$0xff]  ;;  %v1944_v8 = vpack.c.bf16 %v312_v1, %v304_v0  ;;  %v384_v0 = vld [vmem:[#allocation5 + $0x4a8] sm:$0xff] }
  0xd8   : > { %v2072_v12 = vpack.c.bf16 %v314_v4, %v306_v3  ;;  %v392_v1 = vld [vmem:[#allocation5 + $0x4e8] sm:$0xff]  ;;  %v394_v3 = vld [vmem:[#allocation5 + $0x4f8] sm:$0xff]  ;;  %v1962_v4 = vpack.c.bf16 %v375_v60, %v367_v59  ;;  %v455_v59 = vld [vmem:[#allocation5 + $0x6e0] sm:$0xff] }
  0xd9   : > { %1799 = vmatpush1.bf16.msra.mxu0 %v1798_v14  ;;  %v320_v14 = vld [vmem:[#allocation5 + $0x2a8] sm:$0xff]  ;;  %v449_v60 = vld [vmem:[#allocation5 + $0x6b0] sm:$0xff] }
  0xda   : > { %1927 = vmatpush1.bf16.msra.mxu1 %v1926_v15  ;;  %1929 = vmatprep.subr.bf16.mxu0 %v1928_v17  ;;  %v328_v15 = vld [vmem:[#allocation5 + $0x2e8] sm:$0xff]  ;;  %v322_v17 = vld [vmem:[#allocation5 + $0x2b8] sm:$0xff] }
  0xdb   : > { %2057 = vmatprep.subr.bf16.mxu1 %v2056_v20  ;;  %v2074_v20 = vpack.c.bf16 %v313_v13, %v305_v11  ;;  %v1948_v21 = vpack.c.bf16 %v328_v15, %v320_v14  ;;  %v400_v13 = vld [vmem:[#allocation5 + $0x528] sm:$0xff]  ;;  %v402_v15 = vld [vmem:[#allocation5 + $0x538] sm:$0xff] }
  0xdc   : > { %901 = vmatmul.mubr.f32.vlgmr.msra.gmra.mrb[0].mxu0 %v221_v25  ;;  %v408_v14 = vld [vmem:[#allocation5 + $0x568] sm:$0xff] }
  0xdd   : > { %1079 = vmatmul.mubr.f32.vlgmr.msra.gmra.mrb[0].mxu1 %v221_v25  ;;  %1931 = vmatpush1.bf16.msra.mxu0 %v1930_v26  ;;  %v2076_v25 = vpack.c.bf16 %v330_v18, %v322_v17  ;;  %v329_v26 = vld [vmem:[#allocation5 + $0x2f0] sm:$0xff]  ;;  %v410_v17 = vld [vmem:[#allocation5 + $0x578] sm:$0xff] }
  0xde   : > { %2059 = vmatpush1.bf16.msra.mxu1 %v2058_v29  ;;  %906 = vmatprep.mubr.f32.mxu0 %v226_v32  ;;  %v338_v29 = vld [vmem:[#allocation5 + $0x338] sm:$0xff] }
  0xdf   : > { %1084 = vmatprep.mubr.f32.mxu1 %v226_v32  ;;  %1933 = vmatprep.subr.bf16.mxu0 %v1932_v33  ;;  %v2078_v32 = vpack.c.bf16 %v329_v26, %v321_v24  ;;  %v1952_v33 = vpack.c.bf16 %v344_v28, %v336_v27  ;;  %v2080_v37 = vpack.c.bf16 %v346_v30, %v338_v29  ;;  %v416_v26 = vld [vmem:[#allocation5 + $0x5a8] sm:$0xff]  ;;  %v418_v28 = vld [vmem:[#allocation5 + $0x5b8] sm:$0xff] }
  0xe0   : > { %907 = vmatmul.mubr.f32.gmra.mrb[2].mxu0 %v225_v39  ;;  %2061 = vmatprep.subr.bf16.mxu1 %v2060_v36  ;;  %v337_v36 = vld [vmem:[#allocation5 + $0x330] sm:$0xff]  ;;  %v2096_v24 = vpack.c.bf16 %v410_v17, %v402_v15  ;;  %v424_v27 = vld [vmem:[#allocation5 + $0x5e8] sm:$0xff]  ;;  %v426_v29 = vld [vmem:[#allocation5 + $0x5f8] sm:$0xff] }
  0xe1   : > { %1085 = vmatmul.mubr.f32.gmra.mrb[2].mxu1 %v225_v39  ;;  %1935 = vmatpush1.bf16.msra.mxu0 %v1934_v40  ;;  %v352_v39 = vld [vmem:[#allocation5 + $0x3a8] sm:$0xff]  ;;  %v490_v15 = vld [vmem:[#allocation5 + $0x7f8] sm:$0xff] }
  0xe2   : > { %2063 = vmatpush1.bf16.msra.mxu1 %v2062_v43  ;;  %912 = vmatprep.mubr.f32.mxu0 %v230_v46  ;;  %v360_v40 = vld [vmem:[#allocation5 + $0x3e8] sm:$0xff]  ;;  %v1954_v43 = vpack.c.bf16 %v343_v35, %v335_v34  ;;  %v423_v34 = vld [vmem:[#allocation5 + $0x5e0] sm:$0xff]  ;;  %v417_v35 = vld [vmem:[#allocation5 + $0x5b0] sm:$0xff] }
  0xe3   : > { %1090 = vmatprep.mubr.f32.mxu1 %v230_v46  ;;  %1937 = vmatprep.subr.bf16.mxu0 %v1936_v47  ;;  %v1956_v44 = vpack.c.bf16 %v360_v40, %v352_v39  ;;  %v359_v46 = vld [vmem:[#allocation5 + $0x3e0] sm:$0xff]  ;;  %v353_v47 = vld [vmem:[#allocation5 + $0x3b0] sm:$0xff]  ;;  %v440_v39 = vld [vmem:[#allocation5 + $0x668] sm:$0xff] }
  0xe4   : > { %913 = vmatmul.mubr.f32.gmra.mrb[4].mxu0 %v2663_v50  ;;  %2065 = vmatprep.subr.bf16.mxu1 %v2064_v51  ;;  %v368_v51 = vld [vmem:[#allocation5 + $0x428] sm:$0xff]  ;;  %v1958_v56 = vpack.c.bf16 %v359_v46, %v351_v45  ;;  %v2086_v57 = vpack.c.bf16 %v361_v49, %v353_v47  ;;  %v434_v40 = vld [vmem:[#allocation5 + $0x638] sm:$0xff]  ;;  %v439_v45 = vld [vmem:[#allocation5 + $0x660] sm:$0xff] }
  0xe5   : > { %1091 = vmatmul.mubr.f32.gmra.mrb[4].mxu1 %v2663_v50  ;;  %1939 = vmatpush1.bf16.msra.mxu0 %v1938_v54  ;;  %v378_v54 = vld [vmem:[#allocation5 + $0x478] sm:$0xff]  ;;  %v433_v46 = vld [vmem:[#allocation5 + $0x630] sm:$0xff]  ;;  %v2104_v47 = vpack.c.bf16 %v442_v41, %v434_v40  ;;  %v448_v49 = vld [vmem:[#allocation5 + $0x6a8] sm:$0xff] }
  0xe6   : > { %2067 = vmatpush1.bf16.msra.mxu1 %v2066_v58  ;;  %918 = vmatprep.mubr.f32.mxu0 %v2666_v55  ;;  %v1960_v58 = vpack.c.bf16 %v376_v52, %v368_v51  ;;  %v456_v51 = vld [vmem:[#allocation5 + $0x6e8] sm:$0xff]  ;;  %v450_v52 = vld [vmem:[#allocation5 + $0x6b8] sm:$0xff] }
  0xe7   : > { %1096 = vmatprep.mubr.f32.mxu1 %v2666_v55  ;;  %1941 = vmatprep.subr.bf16.mxu0 %v1940_v62  ;;  %v2088_v62 = vpack.c.bf16 %v378_v54, %v370_v53  ;;  %v458_v53 = vld [vmem:[#allocation5 + $0x6f8] sm:$0xff] }
  0xe8   : > { %919 = vmatmul.mubr.f32.gmra.mrb[6].mxu0 %v2671_v5  ;;  %2069 = vmatprep.subr.bf16.mxu1 %v2068_v2  ;;  %v386_v2 = vld [vmem:[#allocation5 + $0x4b8] sm:$0xff] }
  0xe9   : > { %1097 = vmatmul.mubr.f32.gmra.mrb[6].mxu1 %v2671_v5  ;;  %1943 = vmatpush1.bf16.msra.mxu0 %v1942_v6  ;;  %v2090_v6 = vpack.c.bf16 %v377_v63, %v369_v61  ;;  %v2092_v11 = vpack.c.bf16 %v394_v3, %v386_v2  ;;  %v2108_v61 = vpack.c.bf16 %v458_v53, %v450_v52  ;;  %v464_v63 = vld [vmem:[#allocation5 + $0x728] sm:$0xff]  ;;  %v474_v2 = vld [vmem:[#allocation5 + $0x778] sm:$0xff] }
  0xea   : > { %2071 = vmatpush1.bf16.msra.mxu1 %v2070_v7  ;;  %1945 = vmatprep.subr.bf16.mxu0 %v1944_v8  ;;  %v1964_v7 = vpack.c.bf16 %v392_v1, %v384_v0  ;;  %v383_v8 = vld [vmem:[#allocation5 + $0x4a0] sm:$0xff]  ;;  %v472_v0 = vld [vmem:[#allocation5 + $0x768] sm:$0xff]  ;;  %v466_v1 = vld [vmem:[#allocation5 + $0x738] sm:$0xff] }
  0xeb   : > { %2073 = vmatprep.subr.bf16.mxu1 %v2072_v12  ;;  %1167 = vmatprep.mubr.f32.mxu0 %v2646_v16  ;;  %v393_v12 = vld [vmem:[#allocation5 + $0x4f0] sm:$0xff]  ;;  %v1966_v18 = vpack.c.bf16 %v391_v9, %v383_v8  ;;  %v471_v8 = vld [vmem:[#allocation5 + $0x760] sm:$0xff]  ;;  %v522_v40 = vld [vmem:[#allocation5 + $0x8f8] sm:$0xff] }
  0xec   : > { %1345 = vmatprep.mubr.f32.mxu1 %v2646_v16  ;;  %v2082_v16 = vpack.c.bf16 %v345_v38, %v337_v36  ;;  %v2100_v36 = vpack.c.bf16 %v426_v29, %v418_v28  ;;  %v432_v38 = vld [vmem:[#allocation5 + $0x628] sm:$0xff]  ;;  %v465_v9 = vld [vmem:[#allocation5 + $0x730] sm:$0xff]  ;;  %v506_v28 = vld [vmem:[#allocation5 + $0x878] sm:$0xff] }
  0xed   : > { %1947 = vmatpush1.bf16.msra.mxu0 %v1946_v19  ;;  %v2094_v19 = vpack.c.bf16 %v393_v12, %v385_v10  ;;  %v2112_v10 = vpack.c.bf16 %v474_v2, %v466_v1  ;;  %v480_v12 = vld [vmem:[#allocation5 + $0x7a8] sm:$0xff]  ;;  %v530_v52 = vld [vmem:[#allocation5 + $0x938] sm:$0xff] }
  0xee   : > { %2075 = vmatpush1.bf16.msra.mxu1 %v2074_v20  ;;  %1949 = vmatprep.subr.bf16.mxu0 %v1948_v21  ;;  %v1968_v20 = vpack.c.bf16 %v408_v14, %v400_v13  ;;  %v399_v21 = vld [vmem:[#allocation5 + $0x520] sm:$0xff]  ;;  %v488_v13 = vld [vmem:[#allocation5 + $0x7e8] sm:$0xff]  ;;  %v482_v14 = vld [vmem:[#allocation5 + $0x7b8] sm:$0xff] }
  0xef   : > { %2077 = vmatprep.subr.bf16.mxu1 %v2076_v25  ;;  %v409_v25 = vld [vmem:[#allocation5 + $0x570] sm:$0xff]  ;;  %v1970_v30 = vpack.c.bf16 %v407_v22, %v399_v21  ;;  %v487_v21 = vld [vmem:[#allocation5 + $0x7e0] sm:$0xff]  ;;  %v538_v53 = vld [vmem:[#allocation5 + $0x978] sm:$0xff] }
  0xf0   : > { %v481_v22 = vld [vmem:[#allocation5 + $0x7b0] sm:$0xff]  ;;  %v2285_v1 = vld [vmem:[%s2635_s9 + $0x28] sm:$0xff]  ;;  %v546_v2 = vld [vmem:[#allocation5 + $0x9b8] sm:$0xff] }
  0xf1   : > { %1951 = vmatpush1.bf16.msra.mxu0 %v1950_v31  ;;  %v2098_v31 = vpack.c.bf16 %v409_v25, %v401_v23  ;;  %v2116_v23 = vpack.c.bf16 %v490_v15, %v482_v14  ;;  %v496_v25 = vld [vmem:[#allocation5 + $0x828] sm:$0xff] }
  0xf2   : > { %2079 = vmatpush1.bf16.msra.mxu1 %v2078_v32  ;;  %1953 = vmatprep.subr.bf16.mxu0 %v1952_v33  ;;  %v1972_v32 = vpack.c.bf16 %v424_v27, %v416_v26  ;;  %v415_v33 = vld [vmem:[#allocation5 + $0x5a0] sm:$0xff]  ;;  %v504_v26 = vld [vmem:[#allocation5 + $0x868] sm:$0xff]  ;;  %v498_v27 = vld [vmem:[#allocation5 + $0x838] sm:$0xff] }
  0xf3   : > { %2081 = vmatprep.subr.bf16.mxu1 %v2080_v37  ;;  %v425_v37 = vld [vmem:[#allocation5 + $0x5f0] sm:$0xff]  ;;  %v1974_v42 = vpack.c.bf16 %v423_v34, %v415_v33  ;;  %v503_v33 = vld [vmem:[#allocation5 + $0x860] sm:$0xff]  ;;  %v560_v14 = vld [vmem:[#allocation5 + $0xa28] sm:$0xff] }
  0xf4   : > { %v497_v34 = vld [vmem:[#allocation5 + $0x830] sm:$0xff]  ;;  %v568_v15 = vld [vmem:[#allocation5 + $0xa68] sm:$0xff] }
  0xf5   : > { %1955 = vmatpush1.bf16.msra.mxu0 %v1954_v43  ;;  %v2102_v43 = vpack.c.bf16 %v425_v37, %v417_v35  ;;  %v2120_v35 = vpack.c.bf16 %v506_v28, %v498_v27  ;;  %v512_v37 = vld [vmem:[#allocation5 + $0x8a8] sm:$0xff]  ;;  %v569_v28 = vld [vmem:[#allocation5 + $0xa70] sm:$0xff] }
  0xf6   : > { %2083 = vmatpush1.bf16.msra.mxu1 %v2082_v16  ;;  %1957 = vmatprep.subr.bf16.mxu0 %v1956_v44  ;;  %v1976_v16 = vpack.c.bf16 %v440_v39, %v432_v38  ;;  %v431_v44 = vld [vmem:[#allocation5 + $0x620] sm:$0xff]  ;;  %v520_v38 = vld [vmem:[#allocation5 + $0x8e8] sm:$0xff]  ;;  %v514_v39 = vld [vmem:[#allocation5 + $0x8b8] sm:$0xff] }
  0xf7   : > { %2085 = vmatprep.subr.bf16.mxu1 %v2084_v48  ;;  %v441_v48 = vld [vmem:[#allocation5 + $0x670] sm:$0xff]  ;;  %v1978_v54 = vpack.c.bf16 %v439_v45, %v431_v44  ;;  %v519_v44 = vld [vmem:[#allocation5 + $0x8e0] sm:$0xff] }
  0xf8   : > { %v513_v45 = vld [vmem:[#allocation5 + $0x8b0] sm:$0xff] }
  0xf9   : > { %1959 = vmatpush1.bf16.msra.mxu0 %v1958_v56  ;;  %v2106_v56 = vpack.c.bf16 %v441_v48, %v433_v46  ;;  %v2124_v46 = vpack.c.bf16 %v522_v40, %v514_v39  ;;  %v528_v48 = vld [vmem:[#allocation5 + $0x928] sm:$0xff]  ;;  %v583_v39 = vld [vmem:[#allocation5 + $0xae0] sm:$0xff]  ;;  %v577_v40 = vld [vmem:[#allocation5 + $0xab0] sm:$0xff] }
  0xfa   : > { %2087 = vmatpush1.bf16.msra.mxu1 %v2086_v57  ;;  %1961 = vmatprep.subr.bf16.mxu0 %v1960_v58  ;;  %v1980_v57 = vpack.c.bf16 %v456_v51, %v448_v49  ;;  %v447_v58 = vld [vmem:[#allocation5 + $0x6a0] sm:$0xff]  ;;  %v536_v49 = vld [vmem:[#allocation5 + $0x968] sm:$0xff] }
  0xfb   : > { %2089 = vmatprep.subr.bf16.mxu1 %v2088_v62  ;;  %v457_v62 = vld [vmem:[#allocation5 + $0x6f0] sm:$0xff]  ;;  %v1982_v3 = vpack.c.bf16 %v455_v59, %v447_v58  ;;  %v2284_v51 = vld [vmem:[%s2635_s9] sm:$0xff] }
  0xfc   : > { %v527_v58 = vld [vmem:[#allocation5 + $0x920] sm:$0xff] }
  0xfd   : > { %1963 = vmatpush1.bf16.msra.mxu0 %v1962_v4  ;;  %v2110_v4 = vpack.c.bf16 %v457_v62, %v449_v60  ;;  %v535_v59 = vld [vmem:[#allocation5 + $0x960] sm:$0xff]  ;;  %v529_v60 = vld [vmem:[#allocation5 + $0x930] sm:$0xff] }
  0xfe   : > { %2091 = vmatpush1.bf16.msra.mxu1 %v2090_v6  ;;  %1965 = vmatprep.subr.bf16.mxu0 %v1964_v7  ;;  %v1984_v6 = vpack.c.bf16 %v472_v0, %v464_v63  ;;  %v463_v7 = vld [vmem:[#allocation5 + $0x720] sm:$0xff]  ;;  %v537_v62 = vld [vmem:[#allocation5 + $0x970] sm:$0xff]  ;;  %v544_v63 = vld [vmem:[#allocation5 + $0x9a8] sm:$0xff] }
  0xff   : > { %2093 = vmatprep.subr.bf16.mxu1 %v2092_v11  ;;  %v473_v11 = vld [vmem:[#allocation5 + $0x770] sm:$0xff]  ;;  %v1986_v17 = vpack.c.bf16 %v471_v8, %v463_v7  ;;  %v552_v0 = vld [vmem:[#allocation5 + $0x9e8] sm:$0xff]  ;;  %v2130_v7 = vpack.c.bf16 %v537_v62, %v529_v60  ;;  %v618_v60 = vld [vmem:[#allocation5 + $0xbf8] sm:$0xff] }
 0x100   : > { %v2004_v8 = vpack.c.bf16 %v552_v0, %v544_v63  ;;  %v607_v0 = vld [vmem:[#allocation5 + $0xba0] sm:$0xff] }
 0x101   : > { %1967 = vmatpush1.bf16.msra.mxu0 %v1966_v18  ;;  %v2114_v18 = vpack.c.bf16 %v473_v11, %v465_v9  ;;  %v543_v9 = vld [vmem:[#allocation5 + $0x9a0] sm:$0xff]  ;;  %v545_v11 = vld [vmem:[#allocation5 + $0x9b0] sm:$0xff] }
 0x102   : > { %2095 = vmatpush1.bf16.msra.mxu1 %v2094_v19  ;;  %1969 = vmatprep.subr.bf16.mxu0 %v1968_v20  ;;  %v1988_v19 = vpack.c.bf16 %v488_v13, %v480_v12  ;;  %v479_v20 = vld [vmem:[#allocation5 + $0x7a0] sm:$0xff]  ;;  %v553_v13 = vld [vmem:[#allocation5 + $0x9f0] sm:$0xff] }
 0x103   : > { %2097 = vmatprep.subr.bf16.mxu1 %v2096_v24  ;;  %v489_v24 = vld [vmem:[#allocation5 + $0x7f0] sm:$0xff]  ;;  %v1990_v29 = vpack.c.bf16 %v487_v21, %v479_v20  ;;  %v2288_v20 = vld [vmem:[%s2635_s9 + $0x40] sm:$0xff] }
 0x105   : > { %1971 = vmatpush1.bf16.msra.mxu0 %v1970_v30  ;;  %v2118_v30 = vpack.c.bf16 %v489_v24, %v481_v22  ;;  %v2134_v22 = vpack.c.bf16 %v553_v13, %v545_v11  ;;  %v559_v24 = vld [vmem:[#allocation5 + $0xa20] sm:$0xff] }
 0x106   : > { %2099 = vmatpush1.bf16.msra.mxu1 %v2098_v31  ;;  %1973 = vmatprep.subr.bf16.mxu0 %v1972_v32  ;;  %v1992_v31 = vpack.c.bf16 %v504_v26, %v496_v25  ;;  %v495_v32 = vld [vmem:[#allocation5 + $0x820] sm:$0xff]  ;;  %v561_v26 = vld [vmem:[#allocation5 + $0xa30] sm:$0xff] }
 0x107   : > { %2101 = vmatprep.subr.bf16.mxu1 %v2100_v36  ;;  %v505_v36 = vld [vmem:[#allocation5 + $0x870] sm:$0xff]  ;;  %v1994_v41 = vpack.c.bf16 %v503_v33, %v495_v32  ;;  %v567_v25 = vld [vmem:[#allocation5 + $0xa60] sm:$0xff]  ;;  %v578_v32 = vld [vmem:[#allocation5 + $0xab8] sm:$0xff] }
 0x108   : > { %v586_v33 = vld [vmem:[#allocation5 + $0xaf8] sm:$0xff]  ;;  %v623_v13 = vld [vmem:[#allocation5 + $0xc20] sm:$0xff] }
 0x109   : > { %1975 = vmatpush1.bf16.msra.mxu0 %v1974_v42  ;;  %v2122_v42 = vpack.c.bf16 %v505_v36, %v497_v34  ;;  %v2290_v34 = vld [vmem:[%s2635_s9 + $0x60] sm:$0xff]  ;;  %v2138_v36 = vpack.c.bf16 %v569_v28, %v561_v26  ;;  %v641_v28 = vld [vmem:[#allocation5 + $0xcb0] sm:$0xff] }
 0x10a   : > { %2103 = vmatpush1.bf16.msra.mxu1 %v2102_v43  ;;  %1977 = vmatprep.subr.bf16.mxu0 %v1976_v16  ;;  %v1996_v43 = vpack.c.bf16 %v520_v38, %v512_v37  ;;  %v511_v16 = vld [vmem:[#allocation5 + $0x8a0] sm:$0xff] }
 0x10b   : > { %2105 = vmatprep.subr.bf16.mxu1 %v2104_v47  ;;  %v521_v47 = vld [vmem:[#allocation5 + $0x8f0] sm:$0xff]  ;;  %v575_v38 = vld [vmem:[#allocation5 + $0xaa0] sm:$0xff] }
 0x10c   : > { %v639_v26 = vld [vmem:[#allocation5 + $0xca0] sm:$0xff] }
 0x10d   : > { %1979 = vmatpush1.bf16.msra.mxu0 %v1978_v54  ;;  %v1998_v54 = vpack.c.bf16 %v519_v44, %v511_v16  ;;  %v600_v16 = vld [vmem:[#allocation5 + $0xb68] sm:$0xff]  ;;  %v2291_v44 = vld [vmem:[%s2635_s9 + $0x18] sm:$0xff] }
 0x10e   : > { %2107 = vmatpush1.bf16.msra.mxu1 %v2106_v56  ;;  %1981 = vmatprep.subr.bf16.mxu0 %v1980_v57  ;;  %v2126_v56 = vpack.c.bf16 %v521_v47, %v513_v45  ;;  %v2000_v57 = vpack.c.bf16 %v536_v49, %v528_v48  ;;  %v594_v45 = vld [vmem:[#allocation5 + $0xb38] sm:$0xff]  ;;  %v2014_v47 = vpack.c.bf16 %v583_v39, %v575_v38  ;;  %v655_v38 = vld [vmem:[#allocation5 + $0xd20] sm:$0xff] }
 0x10f   : > { %2109 = vmatprep.subr.bf16.mxu1 %v2108_v61  ;;  %v2128_v61 = vpack.c.bf16 %v538_v53, %v530_v52  ;;  %v599_v52 = vld [vmem:[#allocation5 + $0xb60] sm:$0xff]  ;;  %v593_v53 = vld [vmem:[#allocation5 + $0xb30] sm:$0xff] }
 0x110   : > { %v663_v39 = vld [vmem:[#allocation5 + $0xd60] sm:$0xff] }
 0x111   : > { %1983 = vmatpush1.bf16.msra.mxu0 %v1982_v3  ;;  %v554_v3 = vld [vmem:[#allocation5 + $0x9f8] sm:$0xff] }
 0x112   : > { %2111 = vmatpush1.bf16.msra.mxu1 %v2110_v4  ;;  %1985 = vmatprep.subr.bf16.mxu0 %v1984_v6  ;;  %v2286_v4 = vld [vmem:[%s2635_s9 + $0x20] sm:$0xff]  ;;  %v2002_v6 = vpack.c.bf16 %v535_v59, %v527_v58  ;;  %v2132_v12 = vpack.c.bf16 %v554_v3, %v546_v2  ;;  %v616_v58 = vld [vmem:[#allocation5 + $0xbe8] sm:$0xff]  ;;  %v610_v59 = vld [vmem:[#allocation5 + $0xbb8] sm:$0xff] }
 0x113   : > { %2113 = vmatprep.subr.bf16.mxu1 %v2112_v10  ;;  %v551_v10 = vld [vmem:[#allocation5 + $0x9e0] sm:$0xff]  ;;  %v609_v2 = vld [vmem:[#allocation5 + $0xbb0] sm:$0xff]  ;;  %v2148_v3 = vpack.c.bf16 %v618_v60, %v610_v59  ;;  %v698_v59 = vld [vmem:[#allocation5 + $0xe78] sm:$0xff] }
 0x114   : > { %v2006_v21 = vpack.c.bf16 %v551_v10, %v543_v9  ;;  %v634_v9 = vld [vmem:[#allocation5 + $0xc78] sm:$0xff] }
 0x115   : > { %1987 = vmatpush1.bf16.msra.mxu0 %v1986_v17  ;;  %v2287_v17 = vld [vmem:[%s2635_s9 + $0x48] sm:$0xff] }
 0x116   : > { %2115 = vmatpush1.bf16.msra.mxu1 %v2114_v18  ;;  %1989 = vmatprep.subr.bf16.mxu0 %v1988_v19  ;;  %v562_v18 = vld [vmem:[#allocation5 + $0xa38] sm:$0xff] }
 0x117   : > { %2117 = vmatprep.subr.bf16.mxu1 %v2116_v23  ;;  %v570_v19 = vld [vmem:[#allocation5 + $0xa78] sm:$0xff]  ;;  %v2008_v23 = vpack.c.bf16 %v568_v15, %v560_v14  ;;  %v631_v14 = vld [vmem:[#allocation5 + $0xc60] sm:$0xff]  ;;  %v625_v15 = vld [vmem:[#allocation5 + $0xc30] sm:$0xff] }
 0x118   : > { %v2136_v27 = vpack.c.bf16 %v570_v19, %v562_v18  ;;  %v633_v18 = vld [vmem:[#allocation5 + $0xc70] sm:$0xff]  ;;  %v640_v19 = vld [vmem:[#allocation5 + $0xca8] sm:$0xff] }
 0x119   : > { %1991 = vmatpush1.bf16.msra.mxu0 %v1990_v29  ;;  %v576_v29 = vld [vmem:[#allocation5 + $0xaa8] sm:$0xff] }
 0x11a   : > { %2119 = vmatpush1.bf16.msra.mxu1 %v2118_v30  ;;  %1993 = vmatprep.subr.bf16.mxu0 %v1992_v31  ;;  %v584_v30 = vld [vmem:[#allocation5 + $0xae8] sm:$0xff] }
 0x11b   : > { %2121 = vmatprep.subr.bf16.mxu1 %v2120_v35  ;;  %v2289_v31 = vld [vmem:[%s2635_s9 + $0x68] sm:$0xff]  ;;  %v2010_v35 = vpack.c.bf16 %v567_v25, %v559_v24  ;;  %v2012_v37 = vpack.c.bf16 %v584_v30, %v576_v29  ;;  %v2154_v24 = vpack.c.bf16 %v633_v18, %v625_v15  ;;  %v649_v30 = vld [vmem:[#allocation5 + $0xcf0] sm:$0xff] }
 0x11c   : > { %1168 = vmatmul.mubr.f32.vlgmr.msra.gmra.mrb[8].mxu0 %v2284_v51  ;;  %v720_v18 = vld [vmem:[#allocation5 + $0xf28] sm:$0xff] }
 0x11d   : > { %1995 = vmatpush1.bf16.msra.mxu0 %v1994_v41  ;;  %1346 = vmatmul.mubr.f32.vlgmr.msra.gmra.mrb[8].mxu1 %v2284_v51  ;;  %v2140_v41 = vpack.c.bf16 %v586_v33, %v578_v32  ;;  %v591_v51 = vld [vmem:[#allocation5 + $0xb20] sm:$0xff]  ;;  %v664_v32 = vld [vmem:[#allocation5 + $0xd68] sm:$0xff]  ;;  %v658_v33 = vld [vmem:[#allocation5 + $0xd38] sm:$0xff] }
 0x11e   : > { %2123 = vmatpush1.bf16.msra.mxu1 %v2122_v42  ;;  %1997 = vmatprep.subr.bf16.mxu0 %v1996_v43  ;;  %v585_v42 = vld [vmem:[#allocation5 + $0xaf0] sm:$0xff]  ;;  %v592_v43 = vld [vmem:[#allocation5 + $0xb28] sm:$0xff] }
 0x11f   : > { %2125 = vmatprep.subr.bf16.mxu1 %v2124_v46  ;;  %1173 = vmatprep.mubr.f32.mxu0 %v2285_v1  ;;  %v602_v46 = vld [vmem:[#allocation5 + $0xb78] sm:$0xff]  ;;  %v2142_v48 = vpack.c.bf16 %v585_v42, %v577_v40  ;;  %v2016_v49 = vpack.c.bf16 %v600_v16, %v592_v43  ;;  %v657_v40 = vld [vmem:[#allocation5 + $0xd30] sm:$0xff]  ;;  %v672_v43 = vld [vmem:[#allocation5 + $0xda8] sm:$0xff] }
 0x120   : > { %1351 = vmatprep.mubr.f32.mxu1 %v2285_v1  ;;  %1174 = vmatmul.mubr.f32.gmra.mrb[10].mxu0 %v2286_v4  ;;  %v615_v1 = vld [vmem:[#allocation5 + $0xbe0] sm:$0xff]  ;;  %v665_v42 = vld [vmem:[#allocation5 + $0xd70] sm:$0xff]  ;;  %v680_v16 = vld [vmem:[#allocation5 + $0xde8] sm:$0xff] }
 0x121   : > { %1999 = vmatpush1.bf16.msra.mxu0 %v1998_v54  ;;  %1352 = vmatmul.mubr.f32.gmra.mrb[10].mxu1 %v2286_v4  ;;  %v2144_v54 = vpack.c.bf16 %v602_v46, %v594_v45  ;;  %v617_v4 = vld [vmem:[#allocation5 + $0xbf0] sm:$0xff]  ;;  %v2022_v10 = vpack.c.bf16 %v615_v1, %v607_v0  ;;  %v682_v45 = vld [vmem:[#allocation5 + $0xdf8] sm:$0xff]  ;;  %v2034_v46 = vpack.c.bf16 %v663_v39, %v655_v38  ;;  %v695_v0 = vld [vmem:[#allocation5 + $0xe60] sm:$0xff] }
 0x122   : > { %2127 = vmatpush1.bf16.msra.mxu1 %v2126_v56  ;;  %2001 = vmatprep.subr.bf16.mxu0 %v2000_v57  ;;  %v601_v56 = vld [vmem:[#allocation5 + $0xb70] sm:$0xff]  ;;  %v608_v57 = vld [vmem:[#allocation5 + $0xba8] sm:$0xff]  ;;  %v2150_v11 = vpack.c.bf16 %v617_v4, %v609_v2  ;;  %v743_v38 = vld [vmem:[#allocation5 + $0xfe0] sm:$0xff] }
 0x123   : > { %2129 = vmatprep.subr.bf16.mxu1 %v2128_v61  ;;  %1179 = vmatprep.mubr.f32.mxu0 %v2287_v17  ;;  %v2018_v61 = vpack.c.bf16 %v599_v52, %v591_v51  ;;  %v2146_v62 = vpack.c.bf16 %v601_v56, %v593_v53  ;;  %v2020_v63 = vpack.c.bf16 %v616_v58, %v608_v57  ;;  %v679_v51 = vld [vmem:[#allocation5 + $0xde0] sm:$0xff]  ;;  %v673_v52 = vld [vmem:[#allocation5 + $0xdb0] sm:$0xff]  ;;  %v688_v56 = vld [vmem:[#allocation5 + $0xe28] sm:$0xff] }
 0x124   : > { %1357 = vmatprep.mubr.f32.mxu1 %v2287_v17  ;;  %1180 = vmatmul.mubr.f32.gmra.mrb[12].mxu0 %v2288_v20  ;;  %v696_v57 = vld [vmem:[#allocation5 + $0xe68] sm:$0xff]  ;;  %v690_v58 = vld [vmem:[#allocation5 + $0xe38] sm:$0xff]  ;;  %v689_v1 = vld [vmem:[#allocation5 + $0xe30] sm:$0xff] }
 0x125   : > { %2003 = vmatpush1.bf16.msra.mxu0 %v2002_v6  ;;  %1358 = vmatmul.mubr.f32.gmra.mrb[12].mxu1 %v2288_v20  ;;  %v624_v6 = vld [vmem:[#allocation5 + $0xc28] sm:$0xff]  ;;  %v2168_v2 = vpack.c.bf16 %v698_v59, %v690_v58 }
 0x126   : > { %2131 = vmatpush1.bf16.msra.mxu1 %v2130_v7  ;;  %2005 = vmatprep.subr.bf16.mxu0 %v2004_v8  ;;  %v632_v7 = vld [vmem:[#allocation5 + $0xc68] sm:$0xff]  ;;  %v626_v8 = vld [vmem:[#allocation5 + $0xc38] sm:$0xff] }
 0x127   : > { %2133 = vmatprep.subr.bf16.mxu1 %v2132_v12  ;;  %1185 = vmatprep.mubr.f32.mxu0 %v2289_v31  ;;  %v2024_v12 = vpack.c.bf16 %v632_v7, %v624_v6  ;;  %v2152_v17 = vpack.c.bf16 %v634_v9, %v626_v8  ;;  %v648_v20 = vld [vmem:[#allocation5 + $0xce8] sm:$0xff]  ;;  %v706_v7 = vld [vmem:[#allocation5 + $0xeb8] sm:$0xff] }
 0x128   : > { %1363 = vmatprep.mubr.f32.mxu1 %v2289_v31  ;;  %1186 = vmatmul.mubr.f32.gmra.mrb[14].mxu0 %v2290_v34  ;;  %v2028_v25 = vpack.c.bf16 %v648_v20, %v640_v19  ;;  %v656_v31 = vld [vmem:[#allocation5 + $0xd28] sm:$0xff]  ;;  %v714_v8 = vld [vmem:[#allocation5 + $0xef8] sm:$0xff] }
 0x129   : > { %2007 = vmatpush1.bf16.msra.mxu0 %v2006_v21  ;;  %1364 = vmatmul.mubr.f32.gmra.mrb[14].mxu1 %v2290_v34  ;;  %v642_v21 = vld [vmem:[#allocation5 + $0xcb8] sm:$0xff]  ;;  %v704_v4 = vld [vmem:[#allocation5 + $0xea8] sm:$0xff]  ;;  %v2172_v15 = vpack.c.bf16 %v714_v8, %v706_v7 }
 0x12a   : > { %2135 = vmatpush1.bf16.msra.mxu1 %v2134_v22  ;;  %2009 = vmatprep.subr.bf16.mxu0 %v2008_v23  ;;  %v650_v22 = vld [vmem:[#allocation5 + $0xcf8] sm:$0xff]  ;;  %v2026_v23 = vpack.c.bf16 %v631_v14, %v623_v13  ;;  %v712_v6 = vld [vmem:[#allocation5 + $0xee8] sm:$0xff]  ;;  %v711_v13 = vld [vmem:[#allocation5 + $0xee0] sm:$0xff] }
 0x12b   : > { %2137 = vmatprep.subr.bf16.mxu1 %v2136_v27  ;;  %1256 = vmatprep.mubr.f32.mxu0 %v2291_v44  ;;  %v647_v27 = vld [vmem:[#allocation5 + $0xce0] sm:$0xff]  ;;  %v2156_v29 = vpack.c.bf16 %v650_v22, %v642_v21  ;;  %v666_v34 = vld [vmem:[#allocation5 + $0xd78] sm:$0xff]  ;;  %v705_v14 = vld [vmem:[#allocation5 + $0xeb0] sm:$0xff] }
 0x12c   : > { %1434 = vmatprep.mubr.f32.mxu1 %v2291_v44  ;;  %v674_v44 = vld [vmem:[#allocation5 + $0xdb8] sm:$0xff]  ;;  %v728_v19 = vld [vmem:[#allocation5 + $0xf68] sm:$0xff] }
 0x12d   : > { %2011 = vmatpush1.bf16.msra.mxu0 %v2010_v35  ;;  %v2030_v35 = vpack.c.bf16 %v647_v27, %v639_v26  ;;  %v2164_v53 = vpack.c.bf16 %v682_v45, %v674_v44  ;;  %v722_v20 = vld [vmem:[#allocation5 + $0xf38] sm:$0xff]  ;;  %v727_v26 = vld [vmem:[#allocation5 + $0xf60] sm:$0xff]  ;;  %v721_v27 = vld [vmem:[#allocation5 + $0xf30] sm:$0xff] }
 0x12e   : > { %2139 = vmatpush1.bf16.msra.mxu1 %v2138_v36  ;;  %2013 = vmatprep.subr.bf16.mxu0 %v2012_v37  ;;  %v2158_v36 = vpack.c.bf16 %v649_v30, %v641_v28  ;;  %v2032_v37 = vpack.c.bf16 %v664_v32, %v656_v31  ;;  %v730_v21 = vld [vmem:[#allocation5 + $0xf78] sm:$0xff]  ;;  %v736_v30 = vld [vmem:[#allocation5 + $0xfa8] sm:$0xff]  ;;  %v2294_v45 = vld [vmem:[%s2635_s9 + $0x30] sm:$0xff] }
 0x12f   : > { %2141 = vmatprep.subr.bf16.mxu1 %v2140_v41  ;;  %v2160_v41 = vpack.c.bf16 %v666_v34, %v658_v33  ;;  %v2176_v28 = vpack.c.bf16 %v730_v21, %v722_v20  ;;  %v744_v31 = vld [vmem:[#allocation5 + $0xfe8] sm:$0xff]  ;;  %v738_v32 = vld [vmem:[#allocation5 + $0xfb8] sm:$0xff] }
 0x130   : > { %v746_v33 = vld [vmem:[#allocation5 + $0xff8] sm:$0xff] }
 0x131   : > { %2015 = vmatpush1.bf16.msra.mxu0 %v2014_v47  ;;  %v2162_v47 = vpack.c.bf16 %v665_v42, %v657_v40  ;;  %v2180_v39 = vpack.c.bf16 %v746_v33, %v738_v32  ;;  %v737_v40 = vld [vmem:[#allocation5 + $0xfb0] sm:$0xff]  ;;  %v2293_v44 = vld [vmem:[%s2635_s9 + $0x38] sm:$0xff] }
 0x132   : > { %2143 = vmatpush1.bf16.msra.mxu1 %v2142_v48  ;;  %2017 = vmatprep.subr.bf16.mxu0 %v2016_v49  ;;  %v2036_v48 = vpack.c.bf16 %v680_v16, %v672_v43  ;;  %v671_v49 = vld [vmem:[#allocation5 + $0xda0] sm:$0xff]  ;;  %v2292_v16 = vld [vmem:[%s2635_s9 + $0x10] sm:$0xff] }
 0x133   : > { %2145 = vmatprep.subr.bf16.mxu1 %v2144_v54  ;;  %v681_v54 = vld [vmem:[#allocation5 + $0xdf0] sm:$0xff]  ;;  %v2038_v60 = vpack.c.bf16 %v679_v51, %v671_v49 }
 0x135   : > { %2019 = vmatpush1.bf16.msra.mxu0 %v2018_v61  ;;  %v2166_v61 = vpack.c.bf16 %v681_v54, %v673_v52 }
 0x136   : > { %2147 = vmatpush1.bf16.msra.mxu1 %v2146_v62  ;;  %2021 = vmatprep.subr.bf16.mxu0 %v2020_v63  ;;  %v2040_v62 = vpack.c.bf16 %v696_v57, %v688_v56  ;;  %v687_v63 = vld [vmem:[#allocation5 + $0xe20] sm:$0xff] }
 0x137   : > { %2149 = vmatprep.subr.bf16.mxu1 %v2148_v3  ;;  %v697_v3 = vld [vmem:[#allocation5 + $0xe70] sm:$0xff]  ;;  %v2042_v9 = vpack.c.bf16 %v695_v0, %v687_v63 }
 0x139   : > { %2023 = vmatpush1.bf16.msra.mxu0 %v2022_v10  ;;  %v2170_v10 = vpack.c.bf16 %v697_v3, %v689_v1 }
 0x13a   : > { %2151 = vmatpush1.bf16.msra.mxu1 %v2150_v11  ;;  %2025 = vmatprep.subr.bf16.mxu0 %v2024_v12  ;;  %v2044_v11 = vpack.c.bf16 %v712_v6, %v704_v4  ;;  %v703_v12 = vld [vmem:[#allocation5 + $0xea0] sm:$0xff] }
 0x13b   : > { %2153 = vmatprep.subr.bf16.mxu1 %v2152_v17  ;;  %v713_v17 = vld [vmem:[#allocation5 + $0xef0] sm:$0xff]  ;;  %v2046_v22 = vpack.c.bf16 %v711_v13, %v703_v12 }
 0x13d   : > { %2027 = vmatpush1.bf16.msra.mxu0 %v2026_v23  ;;  %v2174_v23 = vpack.c.bf16 %v713_v17, %v705_v14 }
 0x13e   : > { %2155 = vmatpush1.bf16.msra.mxu1 %v2154_v24  ;;  %2029 = vmatprep.subr.bf16.mxu0 %v2028_v25  ;;  %v2048_v24 = vpack.c.bf16 %v728_v19, %v720_v18  ;;  %v719_v25 = vld [vmem:[#allocation5 + $0xf20] sm:$0xff] }
 0x13f   : > { %2157 = vmatprep.subr.bf16.mxu1 %v2156_v29  ;;  %v729_v29 = vld [vmem:[#allocation5 + $0xf70] sm:$0xff]  ;;  %v2050_v34 = vpack.c.bf16 %v727_v26, %v719_v25 }
 0x141   : > { %2031 = vmatpush1.bf16.msra.mxu0 %v2030_v35  ;;  %v2178_v35 = vpack.c.bf16 %v729_v29, %v721_v27 }
 0x142   : > { %2159 = vmatpush1.bf16.msra.mxu1 %v2158_v36  ;;  %2033 = vmatprep.subr.bf16.mxu0 %v2032_v37  ;;  %v2052_v36 = vpack.c.bf16 %v744_v31, %v736_v30  ;;  %v735_v37 = vld [vmem:[#allocation5 + $0xfa0] sm:$0xff] }
 0x143   : > { %2161 = vmatprep.subr.bf16.mxu1 %v2160_v41  ;;  %v745_v41 = vld [vmem:[#allocation5 + $0xff0] sm:$0xff]  ;;  %v2054_v42 = vpack.c.bf16 %v743_v38, %v735_v37 }
 0x144   : > { %v2182_v43 = vpack.c.bf16 %v745_v41, %v737_v40 }
 0x145   : > { %2035 = vmatpush1.bf16.msra.mxu0 %v2034_v46  ;;  %v2295_v46 = vld [vmem:[%s2635_s9 + $0x58] sm:$0xff] }
 0x146   : > { %2163 = vmatpush1.bf16.msra.mxu1 %v2162_v47  ;;  %2037 = vmatprep.subr.bf16.mxu0 %v2036_v48  ;;  %v2296_v47 = vld [vmem:[%s2635_s9 + $0x50] sm:$0xff] }
 0x147   : > { %2165 = vmatprep.subr.bf16.mxu1 %v2164_v53 }
 0x149   : > { %2039 = vmatpush1.bf16.msra.mxu0 %v2038_v60 }
 0x14a   : > { %2167 = vmatpush1.bf16.msra.mxu1 %v2166_v61  ;;  %2041 = vmatprep.subr.bf16.mxu0 %v2040_v62 }
 0x14b   : > { %2169 = vmatprep.subr.bf16.mxu1 %v2168_v2 }
 0x14d   : > { %2043 = vmatpush1.bf16.msra.mxu0 %v2042_v9 }
 0x14e   : > { %2171 = vmatpush1.bf16.msra.mxu1 %v2170_v10  ;;  %2045 = vmatprep.subr.bf16.mxu0 %v2044_v11 }
 0x14f   : > { %2173 = vmatprep.subr.bf16.mxu1 %v2172_v15 }
 0x151   : > { %2047 = vmatpush1.bf16.msra.mxu0 %v2046_v22 }
 0x152   : > { %2175 = vmatpush1.bf16.msra.mxu1 %v2174_v23  ;;  %2049 = vmatprep.subr.bf16.mxu0 %v2048_v24 }
 0x153   : > { %2177 = vmatprep.subr.bf16.mxu1 %v2176_v28 }
 0x155   : > { %2051 = vmatpush1.bf16.msra.mxu0 %v2050_v34 }
 0x156   : > { %2179 = vmatpush1.bf16.msra.mxu1 %v2178_v35  ;;  %2053 = vmatprep.subr.bf16.mxu0 %v2052_v36 }
 0x157   : > { %2181 = vmatprep.subr.bf16.mxu1 %v2180_v39 }
 0x159   : > { %2055 = vmatpush1.bf16.msra.mxu0 %v2054_v42 }
 0x15a   : > { %2183 = vmatpush1.bf16.msra.mxu1 %v2182_v43 }
 0x15c   : > { %1257 = vmatmul.mubr.f32.vlgmr.msra.gmra.mrb[8].mxu0 %v2292_v16 }
 0x15d   : > { %1435 = vmatmul.mubr.f32.vlgmr.msra.gmra.mrb[8].mxu1 %v2292_v16  ;;  %1262 = vmatprep.mubr.f32.mxu0 %v2293_v44 }
 0x15e   : > { %1440 = vmatprep.mubr.f32.mxu1 %v2293_v44 }
 0x160   : > { %1263 = vmatmul.mubr.f32.gmra.mrb[10].mxu0 %v2294_v45 }
 0x161   : > { %1441 = vmatmul.mubr.f32.gmra.mrb[10].mxu1 %v2294_v45  ;;  %1268 = vmatprep.mubr.f32.mxu0 %v2295_v46 }
 0x162   : > { %1446 = vmatprep.mubr.f32.mxu1 %v2295_v46 }
 0x164   : > { %1269 = vmatmul.mubr.f32.gmra.mrb[12].mxu0 %v2663_v50 }
 0x165   : > { %1447 = vmatmul.mubr.f32.gmra.mrb[12].mxu1 %v2296_v47  ;;  %1274 = vmatprep.mubr.f32.mxu0 %v2666_v55 }
 0x166   : > { %1452 = vmatprep.mubr.f32.mxu1 %v2666_v55 }
 0x168   : > { %1275 = vmatmul.mubr.f32.gmra.mrb[14].mxu0 %v2671_v5 }
 0x169   : > { %1453 = vmatmul.mubr.f32.gmra.mrb[14].mxu1 %v2671_v5 }
 0x1af   : > { %v902_v48 = vpop.f32.mrb[0].mxu0 }
 0x1b0   : > { %1459 = vst [vmem:[%s2698_s18] sm:$0xff] %v902_v48  ;;  %v1080_v50 = vpop.f32.mrb[0].mxu1  ;;  %v904_v49 = vpop.f32.mrb[1].mxu0 }
 0x1b1   : > { %1461 = vst [vmem:[%s2698_s18 + $0x10] sm:$0xff] %v1080_v50  ;;  %1460 = vst [vmem:[%s2698_s18 + $0x8] sm:$0xff] %v904_v49  ;;  %v1082_v55 = vpop.f32.mrb[1].mxu1 }
 0x1b2   : > { %1462 = vst [vmem:[%s2698_s18 + $0x18] sm:$0xff] %v1082_v55 }
 0x1b3   : > { %v908_v5 = vpop.f32.mrb[2].mxu0 }
 0x1b4   : > { %1463 = vst [vmem:[%s2698_s18 + $0x20] sm:$0xff] %v908_v5  ;;  %v1086_v51 = vpop.f32.mrb[2].mxu1  ;;  %v910_v52 = vpop.f32.mrb[3].mxu0 }
 0x1b5   : > { %1465 = vst [vmem:[%s2698_s18 + $0x30] sm:$0xff] %v1086_v51  ;;  %1464 = vst [vmem:[%s2698_s18 + $0x28] sm:$0xff] %v910_v52  ;;  %v1088_v53 = vpop.f32.mrb[3].mxu1 }
 0x1b6   : > { %1466 = vst [vmem:[%s2698_s18 + $0x38] sm:$0xff] %v1088_v53 }
 0x1b7   : > { %v914_v54 = vpop.f32.mrb[4].mxu0 }
 0x1b8   : > { %1467 = vst [vmem:[%s2698_s18 + $0x40] sm:$0xff] %v914_v54  ;;  %v1092_v56 = vpop.f32.mrb[4].mxu1  ;;  %v916_v57 = vpop.f32.mrb[5].mxu0 }
 0x1b9   : > { %1469 = vst [vmem:[%s2698_s18 + $0x50] sm:$0xff] %v1092_v56  ;;  %1468 = vst [vmem:[%s2698_s18 + $0x48] sm:$0xff] %v916_v57  ;;  %v1094_v58 = vpop.f32.mrb[5].mxu1 }
 0x1ba   : > { %1470 = vst [vmem:[%s2698_s18 + $0x58] sm:$0xff] %v1094_v58 }
 0x1bb   : > { %v920_v59 = vpop.f32.mrb[6].mxu0 }
 0x1bc   : > { %1471 = vst [vmem:[%s2698_s18 + $0x60] sm:$0xff] %v920_v59  ;;  %v1098_v60 = vpop.f32.mrb[6].mxu1  ;;  %v922_v61 = vpop.f32.mrb[7].mxu0 }
 0x1bd   : > { %1473 = vst [vmem:[%s2698_s18 + $0x70] sm:$0xff] %v1098_v60  ;;  %1472 = vst [vmem:[%s2698_s18 + $0x68] sm:$0xff] %v922_v61  ;;  %v1100_v62 = vpop.f32.mrb[7].mxu1 }
 0x1be   : > { %1474 = vst [vmem:[%s2698_s18 + $0x78] sm:$0xff] %v1100_v62 }
 0x1bf   : > { %2368 = shalt.err (!%p2365_p7)
}
 0x1c0   : > { %s2369_s23 = scalar_lea.hbm %s2723_s5, 2048  ;;  %s2373_s8 = scalar_lea.hbm %s2830_s2, 4096 }
 0x1c1   : > { %p2370_p9 = scmp.ne.s32.totalorder %s2723_s5, %s2369_s23  ;;  %p2374_p5 = scmp.lt.u32.totalorder %s2723_s5, %s2830_s2 }
 0x1c2   : > { %p2375_p11 = scmp.lt.u32.totalorder %s2373_s8, %s2369_s23  ;;  %p2377_p4 = scmp.lt.u32.totalorder %s2369_s23, %s2723_s5 }
 0x1c3   : > { %p2371_p2 = pnand %p2370_p9, %p2580_p12 }
 0x1c4   : > { %p2376_p1 = por %p2375_p11, %p2374_p5 }
 0x1c5   : > { %p2372_p0 = pneg %p2371_p2 }
 0x1c6   : > { %p2378_p6 = por %p2377_p4, %p2376_p1 }
 0x1c8   : > { %p2379_p8 = pnand %p2378_p6, %p2372_p0 }
 0x1ca   : > { %2382 = shalt.err (!%p2379_p8)
}
 0x1cb   : > { %s2466_s25 = smov 512   ;;  %s2467_s26 = smov 32  }
 0x1cc   : > { %2222 = dma.vmem_to_hbm [thread:$0]  (%p2580_p12), %s2725_s4, 2048, %s2723_s5, %s1492_s10, %s2466_s25, %s2466_s25, %s2467_s26  }
 0x1cd   : > { %s2755_s11 = scalar_lea.vmem [#allocation8], %s2631_s7  ;;  %s2776_s10 = scalar_lea.hbm %s2831_s3, %s1669_s20 }
 0x1ce   : > { %s1528_s7 = sshll.u32 %s2755_s11, 4  ;;  %s1497_s27 = scalar_lea.sflag [#allocation9], %s2628_s6  ;;  %s2778_s7 = int_to_ptr.vmem [resolvable:$true] %s1528_s7 }
 0x1cf   : > { %s2383_s28 = scalar_lea.vmem %s2778_s7, 2048  ;;  %s2468_s16 = smov [#allocation8]  }
 0x1d0   : > { %p2384_p10 = scmp.ne.s32.totalorder %s2778_s7, %s2383_s28  ;;  %s2387_s29 = sshll.u32 %s2468_s16, 4  ;;  %s2388_s29 = int_to_ptr.vmem [resolvable:$false] %s2387_s29 }
 0x1d1   : > { %s2389_s20 = scalar_lea.vmem %s2388_s29, 4096  ;;  %p2390_p7 = scmp.lt.s32.totalorder %s2778_s7, %s2388_s29 }
 0x1d2   : > { %p2385_p13 = pnand %p2384_p10, %p2580_p12  ;;  %p2391_p9 = scmp.lt.s32.totalorder %s2389_s20, %s2383_s28 }
 0x1d4   : > { %p2386_p3 = pneg %p2385_p13  ;;  %p2392_p2 = por %p2391_p9, %p2390_p7 }
 0x1d6   : > { %p2393_p0 = pnand %p2392_p2, %p2386_p3 }
 0x22f   : > { %v1258_v63 = vpop.f32.mrb[8].mxu0 }
 0x230   : > { %1475 = vst [vmem:[%s2755_s11] sm:$0xff] %v1258_v63  ;;  %v1436_v0 = vpop.f32.mrb[8].mxu1  ;;  %v1260_v1 = vpop.f32.mrb[9].mxu0 }
 0x231   : > { %1477 = vst [vmem:[%s2755_s11 + $0x10] sm:$0xff] %v1436_v0  ;;  %1476 = vst [vmem:[%s2755_s11 + $0x8] sm:$0xff] %v1260_v1  ;;  %v1438_v2 = vpop.f32.mrb[9].mxu1 }
 0x232   : > { %1478 = vst [vmem:[%s2755_s11 + $0x18] sm:$0xff] %v1438_v2 }
 0x233   : > { %v1264_v3 = vpop.f32.mrb[10].mxu0 }
 0x234   : > { %1479 = vst [vmem:[%s2755_s11 + $0x20] sm:$0xff] %v1264_v3  ;;  %v1442_v4 = vpop.f32.mrb[10].mxu1  ;;  %v1266_v6 = vpop.f32.mrb[11].mxu0 }
 0x235   : > { %1481 = vst [vmem:[%s2755_s11 + $0x30] sm:$0xff] %v1442_v4  ;;  %1480 = vst [vmem:[%s2755_s11 + $0x28] sm:$0xff] %v1266_v6  ;;  %v1444_v7 = vpop.f32.mrb[11].mxu1 }
 0x236   : > { %1482 = vst [vmem:[%s2755_s11 + $0x38] sm:$0xff] %v1444_v7 }
 0x237   : > { %v1270_v8 = vpop.f32.mrb[12].mxu0 }
 0x238   : > { %1483 = vst [vmem:[%s2755_s11 + $0x40] sm:$0xff] %v1270_v8  ;;  %v1448_v9 = vpop.f32.mrb[12].mxu1  ;;  %v1272_v10 = vpop.f32.mrb[13].mxu0 }
 0x239   : > { %1485 = vst [vmem:[%s2755_s11 + $0x50] sm:$0xff] %v1448_v9  ;;  %1484 = vst [vmem:[%s2755_s11 + $0x48] sm:$0xff] %v1272_v10  ;;  %v1450_v11 = vpop.f32.mrb[13].mxu1 }
 0x23a   : > { %1486 = vst [vmem:[%s2755_s11 + $0x58] sm:$0xff] %v1450_v11 }
 0x23b   : > { %v1276_v12 = vpop.f32.mrb[14].mxu0 }
 0x23c   : > { %1487 = vst [vmem:[%s2755_s11 + $0x60] sm:$0xff] %v1276_v12  ;;  %v1454_v13 = vpop.f32.mrb[14].mxu1  ;;  %v1278_v14 = vpop.f32.mrb[15].mxu0 }
 0x23d   : > { %1489 = vst [vmem:[%s2755_s11 + $0x70] sm:$0xff] %v1454_v13  ;;  %1488 = vst [vmem:[%s2755_s11 + $0x68] sm:$0xff] %v1278_v14  ;;  %v1456_v15 = vpop.f32.mrb[15].mxu1 }
 0x23e   : > { %1490 = vst [vmem:[%s2755_s11 + $0x78] sm:$0xff] %v1456_v15 }
 0x23f   : > { %2396 = shalt.err (!%p2393_p0)
}
 0x240   : > { %s2397_s23 = scalar_lea.hbm %s2776_s10, 2048  ;;  %s2401_s8 = scalar_lea.hbm %s2831_s3, 4096 }
 0x241   : > { %p2398_p5 = scmp.ne.s32.totalorder %s2776_s10, %s2397_s23  ;;  %p2402_p4 = scmp.lt.u32.totalorder %s2776_s10, %s2831_s3 }
 0x242   : > { %p2403_p6 = scmp.lt.u32.totalorder %s2401_s8, %s2397_s23  ;;  %p2405_p10 = scmp.lt.u32.totalorder %s2397_s23, %s2776_s10 }
 0x243   : > { %p2399_p11 = pnand %p2398_p5, %p2580_p12 }
 0x244   : > { %p2404_p8 = por %p2403_p6, %p2402_p4 }
 0x245   : > { %p2400_p1 = pneg %p2399_p11 }
 0x246   : > { %p2406_p13 = por %p2405_p10, %p2404_p8 }
 0x248   : > { %p2407_p3 = pnand %p2406_p13, %p2400_p1 }
 0x24a   : > { %2410 = shalt.err (!%p2407_p3)
}
 0x24b   : > { %2223 = dma.vmem_to_hbm [thread:$0]  (%p2580_p12), %s2778_s7, 2048, %s2776_s10, %s1497_s27, %s2466_s25, %s2466_s25, %s2467_s26  }
 0x24c PF: > { %s1543_s11 = sand.u32 1, %s2445_s12   ;;  %p2846_p7 = scmp.ne.s32.totalorder %s2836_s19, 0 }
 0x24d   : > { %p2847_p9 = scmp.ge.s32.totalorder %s2457_s15, 2  ;;  %s1544_s4 = scalar_lea.sflag [#allocation4], %s1543_s11 }
 0x24f   : > { %p2235_p2 = pnand %p2847_p9, %p2846_p7 }
 0x251   : > { %2436 = dma.done.wait (!%p2235_p2), %s1544_s4, 2048  }
 0x252   : > { %2438 = vsyncadd (!%p2235_p2), %s1544_s4, 4294965248  ;;  %s1553_s21 = scalar_lea.sflag [#allocation9], %s1543_s11 }
 0x253   : > { %2440 = dma.done.wait (!%p2235_p2), %s1553_s21, 2048  }
 0x254   : > { %2442 = vsyncadd (!%p2235_p2), %s1553_s21, 4294965248  ;;  %p21_p12 = scmp.ge.s32.totalorder %s2545_s24, 4   ;;  %s2848_s12 = smov %s2449_s13 }
 0x255   : > { %s2849_s13 = smov %s2453_s14  ;;  %s2850_s14 = smov %s2576_s17 }
 0x256   : > { %s2851_s15 = smov %s2545_s24  ;;  %23 = sbr.rel (!%p21_p12) target bundleno = 8 (0x8), region = 94 }
 0x25d   :  { %1558 = vsyncpa [#allocation3], 1 }
 0x25e   :  { %1560 = vsyncpa [#allocation3 + $0x1], 1 }
 0x25f   :  { %1561 = vsyncpa [#allocation6], 1 }
 0x260   :  { %1562 = vsyncpa [#allocation4], 1 }
 0x261   :  { %1564 = vsyncpa [#allocation4 + $0x1], 1 }
 0x262   :  { %1565 = vsyncpa [#allocation9], 1 }
 0x263   :  { %1567 = vsyncpa [#allocation9 + $0x1], 1 }

</bundles_post_ra>
